<compile_context>
chip_gen: v5e
topology: v5e:2x2
jax: 0.10.0
libtpu: 0.0.40
codegen_flags: <defaults>
</compile_context>

<pallas_src>
import jax
import jax.numpy as jnp
from jax.experimental import pallas as pl
from jax.experimental.pallas import tpu as pltpu

EPS = 1e-5  # torch.nn.LayerNorm default eps


# ------------------------- math helpers (pure jnp, used inside the kernel) ---
def _swish(x):
    return x * jax.nn.sigmoid(x)


def _layernorm(x, g, b):
    mean = jnp.mean(x, axis=-1, keepdims=True)
    xc = x - mean
    var = jnp.mean(xc * xc, axis=-1, keepdims=True)
    return xc * jax.lax.rsqrt(var + EPS) * g + b


def _matmul(x, w):
    return jnp.dot(x, w, preferred_element_type=jnp.float32)


# ------------------------------------------------------------------ kernel ---
# Packed parameter layout:
#   vec_ref : (19, D)  rows:
#     res1: 0 n1g, 1 n1b, 2 (l1b+tb), 3 n2g, 4 n2b, 5 (l2b+cb),
#           6 n3g, 7 n3b, 8 l3b
#     res2: 9..17 (same ordering)
#     attn: 18 fused bias  (proj_b_v @ out_w + out_b)
#   w_ref   : (7, D, D)  0..2 res1 l1w/l2w/l3w, 3..5 res2 l1w/l2w/l3w,
#             6 fused attn weight (proj_w_v @ out_w)
#   tw_ref  : (T, 2D)  [res1.time_w | res2.time_w]
#   cw_ref  : (C, 2D)  [res1.cond_w | res2.cond_w]
def middle_block_kernel(x_ref, t_ref, cond_ref, vec_ref, w_ref, tw_ref, cw_ref,
                        o_ref):
    D = x_ref.shape[-1]

    def vec(i):  # (1, D) parameter row, read at point of use
        return vec_ref[i:i + 1, :]

    x = x_ref[...]

    # swish(t)/swish(cond) once; res1+res2 time/cond projections fused into a
    # single matmul each (outputs sliced per resblock below).
    temb = _matmul(_swish(t_ref[...]), tw_ref[...])      # (TB, 2D)
    cemb = _matmul(_swish(cond_ref[...]), cw_ref[...])   # (TB, 2D)

    def resblock(h_in, v0, w0, off):
        h = (_matmul(_swish(_layernorm(h_in, vec(v0 + 0), vec(v0 + 1))),
                     w_ref[w0 + 0])
             + vec(v0 + 2) + temb[:, off:off + D])
        h = (_matmul(_swish(_layernorm(h, vec(v0 + 3), vec(v0 + 4))),
                     w_ref[w0 + 1])
             + vec(v0 + 5) + cemb[:, off:off + D])
        h = (_matmul(_swish(_layernorm(h, vec(v0 + 6), vec(v0 + 7))),
                     w_ref[w0 + 2])
             + vec(v0 + 8))
        return h + h_in  # shortcut = nn.Identity() since in_dim == out_dim

    h = resblock(x, 0, 0, 0)          # res1

    # AttentionBlock (n_heads=1, seq_len=1): softmax over a single key == 1,
    # so attention == output(V(h)) + h.  V- and output-projections are fused
    # into a single (D, D) weight / (1, D) bias wrapper-side.
    h = _matmul(h, w_ref[6]) + vec(18) + h

    h = resblock(h, 9, 3, D)          # res2

    o_ref[...] = h.astype(o_ref.dtype)


# ----------------------------------------------------- parameter packing -----
def pack_params(res1_p, attn_p, res2_p, D):
    (n1g1, n1b1, l1w1, l1b1, n2g1, n2b1, l2w1, l2b1,
     n3g1, n3b1, l3w1, l3b1, tw1, tb1, cw1, cb1) = res1_p
    (n1g2, n1b2, l1w2, l1b2, n2g2, n2b2, l2w2, l2b2,
     n3g2, n3b2, l3w2, l3b2, tw2, tb2, cw2, cb2) = res2_p
    proj_w, proj_b, out_w, out_b = attn_p

    # Only the V slice of the QKV projection matters (softmax over 1 key == 1);
    # fuse V projection + output projection into a single linear.
    proj_w_v = proj_w[:, 2 * D:3 * D]
    proj_b_v = proj_b[:, 2 * D:3 * D]
    attn_w = proj_w_v @ out_w                       # (D, D)
    attn_b = proj_b_v @ out_w + out_b               # (1, D)

    vecs = jnp.concatenate(
        [n1g1, n1b1, l1b1 + tb1, n2g1, n2b1, l2b1 + cb1, n3g1, n3b1, l3b1,
         n1g2, n1b2, l1b2 + tb2, n2g2, n2b2, l2b2 + cb2, n3g2, n3b2, l3b2,
         attn_b], axis=0)                            # (19, D)
    w_dd = jnp.stack([l1w1, l2w1, l3w1, l1w2, l2w2, l3w2, attn_w],
                     axis=0)                         # (7, D, D)
    tw = jnp.concatenate([tw1, tw2], axis=1)         # (T, 2D)
    cw = jnp.concatenate([cw1, cw2], axis=1)         # (C, 2D)
    return vecs, w_dd, tw, cw


# ----------------------------------------------------------------- wrapper ---
def middle_block(x, t, cond, res1_p, attn_p, res2_p, *, batch_tile=512):
    B, D = x.shape
    T = t.shape[-1]
    C = cond.shape[-1]
    vecs, w_dd, tw, cw = pack_params(res1_p, attn_p, res2_p, D)

    TB = min(B, batch_tile)
    assert B % TB == 0, "batch must be divisible by the batch tile"
    grid = (B // TB,)

    return pl.pallas_call(
        middle_block_kernel,
        out_shape=jax.ShapeDtypeStruct((B, D), jnp.float32),
        grid=grid,
        in_specs=[
            pl.BlockSpec((TB, D), lambda i: (i, 0)),       # x
            pl.BlockSpec((TB, T), lambda i: (i, 0)),       # t
            pl.BlockSpec((TB, C), lambda i: (i, 0)),       # cond
            pl.BlockSpec(vecs.shape, lambda i: (0, 0)),          # vector slab
            pl.BlockSpec(w_dd.shape, lambda i: (0, 0, 0)),       # square weights
            pl.BlockSpec(tw.shape, lambda i: (0, 0)),            # fused time w
            pl.BlockSpec(cw.shape, lambda i: (0, 0)),            # fused cond w
        ],
        out_specs=pl.BlockSpec((TB, D), lambda i: (i, 0)),
        compiler_params=pltpu.CompilerParams(
            dimension_semantics=("parallel",),   # megacore sharding on v7x
            vmem_limit_bytes=64 * 1024 * 1024,
        ),
    )(x, t, cond, vecs, w_dd, tw, cw)


# -------------------------------------------------------- parameter set-up ---
def _init_linear(key, fan_in, fan_out):
    kw, kb = jax.random.split(key)
    w = jax.random.normal(kw, (fan_in, fan_out), jnp.float32) * (fan_in ** -0.5)
    b = jax.random.normal(kb, (1, fan_out), jnp.float32) * 0.01
    return w, b


def init_resblock_params(key, D, T, C):
    ks = jax.random.split(key, 5)
    l1w, l1b = _init_linear(ks[0], D, D)
    l2w, l2b = _init_linear(ks[1], D, D)
    l3w, l3b = _init_linear(ks[2], D, D)
    tw, tb = _init_linear(ks[3], T, D)
    cw, cb = _init_linear(ks[4], C, D)
    ones = jnp.ones((1, D), jnp.float32)
    zeros = jnp.zeros((1, D), jnp.float32)
    return [ones, zeros, l1w, l1b,
            ones, zeros, l2w, l2b,
            ones, zeros, l3w, l3b,
            tw, tb, cw, cb]


def init_attn_params(key, D):
    k1, k2 = jax.random.split(key)
    proj_w, proj_b = _init_linear(k1, D, 3 * D)
    out_w, out_b = _init_linear(k2, D, D)
    return [proj_w, proj_b, out_w, out_b]


# --------------------------------------------------------------- reference ---
# Pure-JAX reference faithful to the PyTorch forward (full QKV projection and
# softmax over the singleton key axis, unfolded biases).
def ref_resblock(x, t, cond, p):
    (n1g, n1b, l1w, l1b, n2g, n2b, l2w, l2b,
     n3g, n3b, l3w, l3b, tw, tb, cw, cb) = p

    def ln(v, g, b):
        m = jnp.mean(v, -1, keepdims=True)
        var = jnp.mean((v - m) ** 2, -1, keepdims=True)
        return (v - m) / jnp.sqrt(var + EPS) * g + b

    def sw(v):
        return v * jax.nn.sigmoid(v)

    h = sw(ln(x, n1g, n1b)) @ l1w + l1b
    h = h + (sw(t) @ tw + tb)
    h = sw(ln(h, n2g, n2b)) @ l2w + l2b
    h = h + (sw(cond) @ cw + cb)
    h = sw(ln(h, n3g, n3b)) @ l3w + l3b
    return h + x


def ref_attention(x, p):
    proj_w, proj_b, out_w, out_b = p
    D = x.shape[-1]
    qkv = x @ proj_w + proj_b
    q, k, v = qkv[:, :D], qkv[:, D:2 * D], qkv[:, 2 * D:]
    s = jnp.sum(q * k, axis=-1, keepdims=True) * (float(D) ** -0.5)
    attn = jax.nn.softmax(s, axis=-1)   # softmax over a single key -> 1.0
    res = attn * v
    return res @ out_w + out_b + x


def reference(x, t, cond, res1_p, attn_p, res2_p):
    h = ref_resblock(x, t, cond, res1_p)
    h = ref_attention(h, attn_p)
    h = ref_resblock(h, t, cond, res2_p)
    return h


# -------------------------------------------------------------------- main ---
if __name__ == "__main__":
    # D chosen as a lane-dense 128; batch is a sublane multiple of 8.
    B, D, T, C = 8, 128, 32, 16   # batch, in_dim, time_dim, cond_dim
    key = jax.random.PRNGKey(0)
    kx, kt, kc, k1, k2, k3 = jax.random.split(key, 6)

    x = jax.random.normal(kx, (B, D), jnp.float32)
    t = jax.random.normal(kt, (B, T), jnp.float32)
    cond = jax.random.normal(kc, (B, C), jnp.float32)

    res1_p = init_resblock_params(k1, D, T, C)
    attn_p = init_attn_params(k3, D)
    res2_p = init_resblock_params(k2, D, T, C)

    out = jax.block_until_ready(middle_block(x, t, cond, res1_p, attn_p, res2_p))
    ref = reference(x, t, cond, res1_p, attn_p, res2_p)

    assert out.shape == (B, D)
    assert jnp.allclose(out, ref, atol=2e-4, rtol=2e-4), \
        "mismatch vs pure-JAX reference"
    print("KERNEL_OK")
</pallas_src>

<mosaic_0001>
module attributes {stable_mosaic.version = 11 : i64} {
  func.func @middle_block_kernel(%arg0: i32, %arg1: memref<8x128xf32, #tpu.memory_space<vmem>>, %arg2: memref<8x32xf32, #tpu.memory_space<vmem>>, %arg3: memref<8x16xf32, #tpu.memory_space<vmem>>, %arg4: memref<19x128xf32, #tpu.memory_space<vmem>>, %arg5: memref<7x128x128xf32, #tpu.memory_space<vmem>>, %arg6: memref<32x256xf32, #tpu.memory_space<vmem>>, %arg7: memref<16x256xf32, #tpu.memory_space<vmem>>, %arg8: memref<8x128xf32, #tpu.memory_space<vmem>>) attributes {dimension_semantics = [#tpu.dimension_semantics<parallel>], iteration_bounds = array<i64: 1>, scalar_prefetch = 0 : i64, scratch_operands = 0 : i64, tpu.core_type = #tpu.core_type<tc>, window_params = [{transform_indices = @transform_0, window_bounds = array<i64: 8, 128>}, {transform_indices = @transform_1, window_bounds = array<i64: 8, 32>}, {transform_indices = @transform_2, window_bounds = array<i64: 8, 16>}, {pipeline_mode = #tpu.pipeline_mode<synchronous>, transform_indices = @transform_3, window_bounds = array<i64: 19, 128>}, {pipeline_mode = #tpu.pipeline_mode<synchronous>, transform_indices = @transform_4, window_bounds = array<i64: 7, 128, 128>}, {pipeline_mode = #tpu.pipeline_mode<synchronous>, transform_indices = @transform_5, window_bounds = array<i64: 32, 256>}, {pipeline_mode = #tpu.pipeline_mode<synchronous>, transform_indices = @transform_6, window_bounds = array<i64: 16, 256>}, {transform_indices = @transform_7, window_bounds = array<i64: 8, 128>}]} {
    %c0 = arith.constant 0 : index
    %c0_0 = arith.constant 0 : index
    %0 = vector.load %arg1[%c0, %c0_0] : memref<8x128xf32, #tpu.memory_space<vmem>>, vector<8x128xf32>
    %c0_1 = arith.constant 0 : index
    %c0_2 = arith.constant 0 : index
    %1 = vector.load %arg2[%c0_1, %c0_2] : memref<8x32xf32, #tpu.memory_space<vmem>>, vector<8x32xf32>
    %2 = arith.negf %1 : vector<8x32xf32>
    %3 = math.exp %2 : vector<8x32xf32>
    %cst = arith.constant 1.000000e+00 : f32
    %4 = vector.broadcast %cst : f32 to vector<8x32xf32>
    %5 = arith.addf %4, %3 : vector<8x32xf32>
    %6 = arith.divf %4, %5 : vector<8x32xf32>
    %7 = arith.mulf %1, %6 : vector<8x32xf32>
    %c0_3 = arith.constant 0 : index
    %c0_4 = arith.constant 0 : index
    %8 = vector.load %arg6[%c0_3, %c0_4] : memref<32x256xf32, #tpu.memory_space<vmem>>, vector<32x256xf32>
    %cst_5 = arith.constant dense<0.000000e+00> : vector<8x256xf32>
    %9 = tpu.matmul %7, %8, %cst_5 {dimension_numbers = #tpu.dot_dimension_numbers<[1], [0], [0], [1], [0, 0, 1, 1], [], []>} : vector<8x32xf32>, vector<32x256xf32>, vector<8x256xf32> -> vector<8x256xf32>
    %c0_6 = arith.constant 0 : index
    %c0_7 = arith.constant 0 : index
    %10 = vector.load %arg3[%c0_6, %c0_7] : memref<8x16xf32, #tpu.memory_space<vmem>>, vector<8x16xf32>
    %11 = arith.negf %10 : vector<8x16xf32>
    %12 = math.exp %11 : vector<8x16xf32>
    %cst_8 = arith.constant 1.000000e+00 : f32
    %13 = vector.broadcast %cst_8 : f32 to vector<8x16xf32>
    %14 = arith.addf %13, %12 : vector<8x16xf32>
    %15 = arith.divf %13, %14 : vector<8x16xf32>
    %16 = arith.mulf %10, %15 : vector<8x16xf32>
    %c0_9 = arith.constant 0 : index
    %c0_10 = arith.constant 0 : index
    %17 = vector.load %arg7[%c0_9, %c0_10] : memref<16x256xf32, #tpu.memory_space<vmem>>, vector<16x256xf32>
    %cst_11 = arith.constant dense<0.000000e+00> : vector<8x256xf32>
    %18 = tpu.matmul %16, %17, %cst_11 {dimension_numbers = #tpu.dot_dimension_numbers<[1], [0], [0], [1], [0, 0, 1, 1], [], []>} : vector<8x16xf32>, vector<16x256xf32>, vector<8x256xf32> -> vector<8x256xf32>
    %c0_12 = arith.constant 0 : index
    %c0_13 = arith.constant 0 : index
    %19 = vector.load %arg4[%c0_12, %c0_13] : memref<19x128xf32, #tpu.memory_space<vmem>>, vector<1x128xf32>
    %c1 = arith.constant 1 : index
    %c0_14 = arith.constant 0 : index
    %20 = vector.load %arg4[%c1, %c0_14] : memref<19x128xf32, #tpu.memory_space<vmem>>, vector<1x128xf32>
    %cst_15 = arith.constant dense<0.000000e+00> : vector<8xf32>
    %21 = vector.multi_reduction <add>, %0, %cst_15 [1] : vector<8x128xf32> to vector<8xf32>
    %22 = vector.shape_cast %21 : vector<8xf32> to vector<8x1xf32>
    %cst_16 = arith.constant 1.280000e+02 : f32
    %23 = vector.broadcast %cst_16 : f32 to vector<8x1xf32>
    %24 = arith.divf %22, %23 : vector<8x1xf32>
    %25 = vector.broadcast %24 : vector<8x1xf32> to vector<8x128xf32>
    %26 = arith.subf %0, %25 : vector<8x128xf32>
    %27 = arith.mulf %26, %26 : vector<8x128xf32>
    %cst_17 = arith.constant dense<0.000000e+00> : vector<8xf32>
    %28 = vector.multi_reduction <add>, %27, %cst_17 [1] : vector<8x128xf32> to vector<8xf32>
    %29 = vector.shape_cast %28 : vector<8xf32> to vector<8x1xf32>
    %cst_18 = arith.constant 1.280000e+02 : f32
    %30 = vector.broadcast %cst_18 : f32 to vector<8x1xf32>
    %31 = arith.divf %29, %30 : vector<8x1xf32>
    %cst_19 = arith.constant 9.99999974E-6 : f32
    %32 = vector.broadcast %cst_19 : f32 to vector<8x1xf32>
    %33 = arith.addf %31, %32 : vector<8x1xf32>
    %34 = math.rsqrt %33 : vector<8x1xf32>
    %35 = vector.broadcast %34 : vector<8x1xf32> to vector<8x128xf32>
    %36 = arith.mulf %26, %35 : vector<8x128xf32>
    %37 = vector.broadcast %19 : vector<1x128xf32> to vector<8x128xf32>
    %38 = arith.mulf %36, %37 : vector<8x128xf32>
    %39 = vector.broadcast %20 : vector<1x128xf32> to vector<8x128xf32>
    %40 = arith.addf %38, %39 : vector<8x128xf32>
    %41 = arith.negf %40 : vector<8x128xf32>
    %42 = math.exp %41 : vector<8x128xf32>
    %cst_20 = arith.constant 1.000000e+00 : f32
    %43 = vector.broadcast %cst_20 : f32 to vector<8x128xf32>
    %44 = arith.addf %43, %42 : vector<8x128xf32>
    %45 = arith.divf %43, %44 : vector<8x128xf32>
    %46 = arith.mulf %40, %45 : vector<8x128xf32>
    %c0_21 = arith.constant 0 : index
    %c0_22 = arith.constant 0 : index
    %c0_23 = arith.constant 0 : index
    %47 = vector.load %arg5[%c0_21, %c0_22, %c0_23] : memref<7x128x128xf32, #tpu.memory_space<vmem>>, vector<1x128x128xf32>
    %48 = vector.shape_cast %47 : vector<1x128x128xf32> to vector<128x128xf32>
    %cst_24 = arith.constant dense<0.000000e+00> : vector<8x128xf32>
    %49 = tpu.matmul %46, %48, %cst_24 {dimension_numbers = #tpu.dot_dimension_numbers<[1], [0], [0], [1], [0, 0, 1, 1], [], []>} : vector<8x128xf32>, vector<128x128xf32>, vector<8x128xf32> -> vector<8x128xf32>
    %c2 = arith.constant 2 : index
    %c0_25 = arith.constant 0 : index
    %50 = vector.load %arg4[%c2, %c0_25] : memref<19x128xf32, #tpu.memory_space<vmem>>, vector<1x128xf32>
    %51 = vector.broadcast %50 : vector<1x128xf32> to vector<8x128xf32>
    %52 = arith.addf %49, %51 : vector<8x128xf32>
    %53 = vector.extract_strided_slice %9 {offsets = [0, 0], sizes = [8, 128], strides = [1, 1]} : vector<8x256xf32> to vector<8x128xf32>
    %54 = arith.addf %52, %53 : vector<8x128xf32>
    %c3 = arith.constant 3 : index
    %c0_26 = arith.constant 0 : index
    %55 = vector.load %arg4[%c3, %c0_26] : memref<19x128xf32, #tpu.memory_space<vmem>>, vector<1x128xf32>
    %c4 = arith.constant 4 : index
    %c0_27 = arith.constant 0 : index
    %56 = vector.load %arg4[%c4, %c0_27] : memref<19x128xf32, #tpu.memory_space<vmem>>, vector<1x128xf32>
    %cst_28 = arith.constant dense<0.000000e+00> : vector<8xf32>
    %57 = vector.multi_reduction <add>, %54, %cst_28 [1] : vector<8x128xf32> to vector<8xf32>
    %58 = vector.shape_cast %57 : vector<8xf32> to vector<8x1xf32>
    %cst_29 = arith.constant 1.280000e+02 : f32
    %59 = vector.broadcast %cst_29 : f32 to vector<8x1xf32>
    %60 = arith.divf %58, %59 : vector<8x1xf32>
    %61 = vector.broadcast %60 : vector<8x1xf32> to vector<8x128xf32>
    %62 = arith.subf %54, %61 : vector<8x128xf32>
    %63 = arith.mulf %62, %62 : vector<8x128xf32>
    %cst_30 = arith.constant dense<0.000000e+00> : vector<8xf32>
    %64 = vector.multi_reduction <add>, %63, %cst_30 [1] : vector<8x128xf32> to vector<8xf32>
    %65 = vector.shape_cast %64 : vector<8xf32> to vector<8x1xf32>
    %cst_31 = arith.constant 1.280000e+02 : f32
    %66 = vector.broadcast %cst_31 : f32 to vector<8x1xf32>
    %67 = arith.divf %65, %66 : vector<8x1xf32>
    %cst_32 = arith.constant 9.99999974E-6 : f32
    %68 = vector.broadcast %cst_32 : f32 to vector<8x1xf32>
    %69 = arith.addf %67, %68 : vector<8x1xf32>
    %70 = math.rsqrt %69 : vector<8x1xf32>
    %71 = vector.broadcast %70 : vector<8x1xf32> to vector<8x128xf32>
    %72 = arith.mulf %62, %71 : vector<8x128xf32>
    %73 = vector.broadcast %55 : vector<1x128xf32> to vector<8x128xf32>
    %74 = arith.mulf %72, %73 : vector<8x128xf32>
    %75 = vector.broadcast %56 : vector<1x128xf32> to vector<8x128xf32>
    %76 = arith.addf %74, %75 : vector<8x128xf32>
    %77 = arith.negf %76 : vector<8x128xf32>
    %78 = math.exp %77 : vector<8x128xf32>
    %cst_33 = arith.constant 1.000000e+00 : f32
    %79 = vector.broadcast %cst_33 : f32 to vector<8x128xf32>
    %80 = arith.addf %79, %78 : vector<8x128xf32>
    %81 = arith.divf %79, %80 : vector<8x128xf32>
    %82 = arith.mulf %76, %81 : vector<8x128xf32>
    %c1_34 = arith.constant 1 : index
    %c0_35 = arith.constant 0 : index
    %c0_36 = arith.constant 0 : index
    %83 = vector.load %arg5[%c1_34, %c0_35, %c0_36] : memref<7x128x128xf32, #tpu.memory_space<vmem>>, vector<1x128x128xf32>
    %84 = vector.shape_cast %83 : vector<1x128x128xf32> to vector<128x128xf32>
    %cst_37 = arith.constant dense<0.000000e+00> : vector<8x128xf32>
    %85 = tpu.matmul %82, %84, %cst_37 {dimension_numbers = #tpu.dot_dimension_numbers<[1], [0], [0], [1], [0, 0, 1, 1], [], []>} : vector<8x128xf32>, vector<128x128xf32>, vector<8x128xf32> -> vector<8x128xf32>
    %c5 = arith.constant 5 : index
    %c0_38 = arith.constant 0 : index
    %86 = vector.load %arg4[%c5, %c0_38] : memref<19x128xf32, #tpu.memory_space<vmem>>, vector<1x128xf32>
    %87 = vector.broadcast %86 : vector<1x128xf32> to vector<8x128xf32>
    %88 = arith.addf %85, %87 : vector<8x128xf32>
    %89 = vector.extract_strided_slice %18 {offsets = [0, 0], sizes = [8, 128], strides = [1, 1]} : vector<8x256xf32> to vector<8x128xf32>
    %90 = arith.addf %88, %89 : vector<8x128xf32>
    %c6 = arith.constant 6 : index
    %c0_39 = arith.constant 0 : index
    %91 = vector.load %arg4[%c6, %c0_39] : memref<19x128xf32, #tpu.memory_space<vmem>>, vector<1x128xf32>
    %c7 = arith.constant 7 : index
    %c0_40 = arith.constant 0 : index
    %92 = vector.load %arg4[%c7, %c0_40] : memref<19x128xf32, #tpu.memory_space<vmem>>, vector<1x128xf32>
    %cst_41 = arith.constant dense<0.000000e+00> : vector<8xf32>
    %93 = vector.multi_reduction <add>, %90, %cst_41 [1] : vector<8x128xf32> to vector<8xf32>
    %94 = vector.shape_cast %93 : vector<8xf32> to vector<8x1xf32>
    %cst_42 = arith.constant 1.280000e+02 : f32
    %95 = vector.broadcast %cst_42 : f32 to vector<8x1xf32>
    %96 = arith.divf %94, %95 : vector<8x1xf32>
    %97 = vector.broadcast %96 : vector<8x1xf32> to vector<8x128xf32>
    %98 = arith.subf %90, %97 : vector<8x128xf32>
    %99 = arith.mulf %98, %98 : vector<8x128xf32>
    %cst_43 = arith.constant dense<0.000000e+00> : vector<8xf32>
    %100 = vector.multi_reduction <add>, %99, %cst_43 [1] : vector<8x128xf32> to vector<8xf32>
    %101 = vector.shape_cast %100 : vector<8xf32> to vector<8x1xf32>
    %cst_44 = arith.constant 1.280000e+02 : f32
    %102 = vector.broadcast %cst_44 : f32 to vector<8x1xf32>
    %103 = arith.divf %101, %102 : vector<8x1xf32>
    %cst_45 = arith.constant 9.99999974E-6 : f32
    %104 = vector.broadcast %cst_45 : f32 to vector<8x1xf32>
    %105 = arith.addf %103, %104 : vector<8x1xf32>
    %106 = math.rsqrt %105 : vector<8x1xf32>
    %107 = vector.broadcast %106 : vector<8x1xf32> to vector<8x128xf32>
    %108 = arith.mulf %98, %107 : vector<8x128xf32>
    %109 = vector.broadcast %91 : vector<1x128xf32> to vector<8x128xf32>
    %110 = arith.mulf %108, %109 : vector<8x128xf32>
    %111 = vector.broadcast %92 : vector<1x128xf32> to vector<8x128xf32>
    %112 = arith.addf %110, %111 : vector<8x128xf32>
    %113 = arith.negf %112 : vector<8x128xf32>
    %114 = math.exp %113 : vector<8x128xf32>
    %cst_46 = arith.constant 1.000000e+00 : f32
    %115 = vector.broadcast %cst_46 : f32 to vector<8x128xf32>
    %116 = arith.addf %115, %114 : vector<8x128xf32>
    %117 = arith.divf %115, %116 : vector<8x128xf32>
    %118 = arith.mulf %112, %117 : vector<8x128xf32>
    %c2_47 = arith.constant 2 : index
    %c0_48 = arith.constant 0 : index
    %c0_49 = arith.constant 0 : index
    %119 = vector.load %arg5[%c2_47, %c0_48, %c0_49] : memref<7x128x128xf32, #tpu.memory_space<vmem>>, vector<1x128x128xf32>
    %120 = vector.shape_cast %119 : vector<1x128x128xf32> to vector<128x128xf32>
    %cst_50 = arith.constant dense<0.000000e+00> : vector<8x128xf32>
    %121 = tpu.matmul %118, %120, %cst_50 {dimension_numbers = #tpu.dot_dimension_numbers<[1], [0], [0], [1], [0, 0, 1, 1], [], []>} : vector<8x128xf32>, vector<128x128xf32>, vector<8x128xf32> -> vector<8x128xf32>
    %c8 = arith.constant 8 : index
    %c0_51 = arith.constant 0 : index
    %122 = vector.load %arg4[%c8, %c0_51] : memref<19x128xf32, #tpu.memory_space<vmem>>, vector<1x128xf32>
    %123 = vector.broadcast %122 : vector<1x128xf32> to vector<8x128xf32>
    %124 = arith.addf %121, %123 : vector<8x128xf32>
    %125 = arith.addf %124, %0 : vector<8x128xf32>
    %c6_52 = arith.constant 6 : index
    %c0_53 = arith.constant 0 : index
    %c0_54 = arith.constant 0 : index
    %126 = vector.load %arg5[%c6_52, %c0_53, %c0_54] : memref<7x128x128xf32, #tpu.memory_space<vmem>>, vector<1x128x128xf32>
    %127 = vector.shape_cast %126 : vector<1x128x128xf32> to vector<128x128xf32>
    %cst_55 = arith.constant dense<0.000000e+00> : vector<8x128xf32>
    %128 = tpu.matmul %125, %127, %cst_55 {dimension_numbers = #tpu.dot_dimension_numbers<[1], [0], [0], [1], [0, 0, 1, 1], [], []>} : vector<8x128xf32>, vector<128x128xf32>, vector<8x128xf32> -> vector<8x128xf32>
    %c18 = arith.constant 18 : index
    %c0_56 = arith.constant 0 : index
    %129 = vector.load %arg4[%c18, %c0_56] : memref<19x128xf32, #tpu.memory_space<vmem>>, vector<1x128xf32>
    %130 = vector.broadcast %129 : vector<1x128xf32> to vector<8x128xf32>
    %131 = arith.addf %128, %130 : vector<8x128xf32>
    %132 = arith.addf %131, %125 : vector<8x128xf32>
    %c9 = arith.constant 9 : index
    %c0_57 = arith.constant 0 : index
    %133 = vector.load %arg4[%c9, %c0_57] : memref<19x128xf32, #tpu.memory_space<vmem>>, vector<1x128xf32>
    %c10 = arith.constant 10 : index
    %c0_58 = arith.constant 0 : index
    %134 = vector.load %arg4[%c10, %c0_58] : memref<19x128xf32, #tpu.memory_space<vmem>>, vector<1x128xf32>
    %cst_59 = arith.constant dense<0.000000e+00> : vector<8xf32>
    %135 = vector.multi_reduction <add>, %132, %cst_59 [1] : vector<8x128xf32> to vector<8xf32>
    %136 = vector.shape_cast %135 : vector<8xf32> to vector<8x1xf32>
    %cst_60 = arith.constant 1.280000e+02 : f32
    %137 = vector.broadcast %cst_60 : f32 to vector<8x1xf32>
    %138 = arith.divf %136, %137 : vector<8x1xf32>
    %139 = vector.broadcast %138 : vector<8x1xf32> to vector<8x128xf32>
    %140 = arith.subf %132, %139 : vector<8x128xf32>
    %141 = arith.mulf %140, %140 : vector<8x128xf32>
    %cst_61 = arith.constant dense<0.000000e+00> : vector<8xf32>
    %142 = vector.multi_reduction <add>, %141, %cst_61 [1] : vector<8x128xf32> to vector<8xf32>
    %143 = vector.shape_cast %142 : vector<8xf32> to vector<8x1xf32>
    %cst_62 = arith.constant 1.280000e+02 : f32
    %144 = vector.broadcast %cst_62 : f32 to vector<8x1xf32>
    %145 = arith.divf %143, %144 : vector<8x1xf32>
    %cst_63 = arith.constant 9.99999974E-6 : f32
    %146 = vector.broadcast %cst_63 : f32 to vector<8x1xf32>
    %147 = arith.addf %145, %146 : vector<8x1xf32>
    %148 = math.rsqrt %147 : vector<8x1xf32>
    %149 = vector.broadcast %148 : vector<8x1xf32> to vector<8x128xf32>
    %150 = arith.mulf %140, %149 : vector<8x128xf32>
    %151 = vector.broadcast %133 : vector<1x128xf32> to vector<8x128xf32>
    %152 = arith.mulf %150, %151 : vector<8x128xf32>
    %153 = vector.broadcast %134 : vector<1x128xf32> to vector<8x128xf32>
    %154 = arith.addf %152, %153 : vector<8x128xf32>
    %155 = arith.negf %154 : vector<8x128xf32>
    %156 = math.exp %155 : vector<8x128xf32>
    %cst_64 = arith.constant 1.000000e+00 : f32
    %157 = vector.broadcast %cst_64 : f32 to vector<8x128xf32>
    %158 = arith.addf %157, %156 : vector<8x128xf32>
    %159 = arith.divf %157, %158 : vector<8x128xf32>
    %160 = arith.mulf %154, %159 : vector<8x128xf32>
    %c3_65 = arith.constant 3 : index
    %c0_66 = arith.constant 0 : index
    %c0_67 = arith.constant 0 : index
    %161 = vector.load %arg5[%c3_65, %c0_66, %c0_67] : memref<7x128x128xf32, #tpu.memory_space<vmem>>, vector<1x128x128xf32>
    %162 = vector.shape_cast %161 : vector<1x128x128xf32> to vector<128x128xf32>
    %cst_68 = arith.constant dense<0.000000e+00> : vector<8x128xf32>
    %163 = tpu.matmul %160, %162, %cst_68 {dimension_numbers = #tpu.dot_dimension_numbers<[1], [0], [0], [1], [0, 0, 1, 1], [], []>} : vector<8x128xf32>, vector<128x128xf32>, vector<8x128xf32> -> vector<8x128xf32>
    %c11 = arith.constant 11 : index
    %c0_69 = arith.constant 0 : index
    %164 = vector.load %arg4[%c11, %c0_69] : memref<19x128xf32, #tpu.memory_space<vmem>>, vector<1x128xf32>
    %165 = vector.broadcast %164 : vector<1x128xf32> to vector<8x128xf32>
    %166 = arith.addf %163, %165 : vector<8x128xf32>
    %167 = vector.extract_strided_slice %9 {offsets = [0, 128], sizes = [8, 128], strides = [1, 1]} : vector<8x256xf32> to vector<8x128xf32>
    %168 = arith.addf %166, %167 : vector<8x128xf32>
    %c12 = arith.constant 12 : index
    %c0_70 = arith.constant 0 : index
    %169 = vector.load %arg4[%c12, %c0_70] : memref<19x128xf32, #tpu.memory_space<vmem>>, vector<1x128xf32>
    %c13 = arith.constant 13 : index
    %c0_71 = arith.constant 0 : index
    %170 = vector.load %arg4[%c13, %c0_71] : memref<19x128xf32, #tpu.memory_space<vmem>>, vector<1x128xf32>
    %cst_72 = arith.constant dense<0.000000e+00> : vector<8xf32>
    %171 = vector.multi_reduction <add>, %168, %cst_72 [1] : vector<8x128xf32> to vector<8xf32>
    %172 = vector.shape_cast %171 : vector<8xf32> to vector<8x1xf32>
    %cst_73 = arith.constant 1.280000e+02 : f32
    %173 = vector.broadcast %cst_73 : f32 to vector<8x1xf32>
    %174 = arith.divf %172, %173 : vector<8x1xf32>
    %175 = vector.broadcast %174 : vector<8x1xf32> to vector<8x128xf32>
    %176 = arith.subf %168, %175 : vector<8x128xf32>
    %177 = arith.mulf %176, %176 : vector<8x128xf32>
    %cst_74 = arith.constant dense<0.000000e+00> : vector<8xf32>
    %178 = vector.multi_reduction <add>, %177, %cst_74 [1] : vector<8x128xf32> to vector<8xf32>
    %179 = vector.shape_cast %178 : vector<8xf32> to vector<8x1xf32>
    %cst_75 = arith.constant 1.280000e+02 : f32
    %180 = vector.broadcast %cst_75 : f32 to vector<8x1xf32>
    %181 = arith.divf %179, %180 : vector<8x1xf32>
    %cst_76 = arith.constant 9.99999974E-6 : f32
    %182 = vector.broadcast %cst_76 : f32 to vector<8x1xf32>
    %183 = arith.addf %181, %182 : vector<8x1xf32>
    %184 = math.rsqrt %183 : vector<8x1xf32>
    %185 = vector.broadcast %184 : vector<8x1xf32> to vector<8x128xf32>
    %186 = arith.mulf %176, %185 : vector<8x128xf32>
    %187 = vector.broadcast %169 : vector<1x128xf32> to vector<8x128xf32>
    %188 = arith.mulf %186, %187 : vector<8x128xf32>
    %189 = vector.broadcast %170 : vector<1x128xf32> to vector<8x128xf32>
    %190 = arith.addf %188, %189 : vector<8x128xf32>
    %191 = arith.negf %190 : vector<8x128xf32>
    %192 = math.exp %191 : vector<8x128xf32>
    %cst_77 = arith.constant 1.000000e+00 : f32
    %193 = vector.broadcast %cst_77 : f32 to vector<8x128xf32>
    %194 = arith.addf %193, %192 : vector<8x128xf32>
    %195 = arith.divf %193, %194 : vector<8x128xf32>
    %196 = arith.mulf %190, %195 : vector<8x128xf32>
    %c4_78 = arith.constant 4 : index
    %c0_79 = arith.constant 0 : index
    %c0_80 = arith.constant 0 : index
    %197 = vector.load %arg5[%c4_78, %c0_79, %c0_80] : memref<7x128x128xf32, #tpu.memory_space<vmem>>, vector<1x128x128xf32>
    %198 = vector.shape_cast %197 : vector<1x128x128xf32> to vector<128x128xf32>
    %cst_81 = arith.constant dense<0.000000e+00> : vector<8x128xf32>
    %199 = tpu.matmul %196, %198, %cst_81 {dimension_numbers = #tpu.dot_dimension_numbers<[1], [0], [0], [1], [0, 0, 1, 1], [], []>} : vector<8x128xf32>, vector<128x128xf32>, vector<8x128xf32> -> vector<8x128xf32>
    %c14 = arith.constant 14 : index
    %c0_82 = arith.constant 0 : index
    %200 = vector.load %arg4[%c14, %c0_82] : memref<19x128xf32, #tpu.memory_space<vmem>>, vector<1x128xf32>
    %201 = vector.broadcast %200 : vector<1x128xf32> to vector<8x128xf32>
    %202 = arith.addf %199, %201 : vector<8x128xf32>
    %203 = vector.extract_strided_slice %18 {offsets = [0, 128], sizes = [8, 128], strides = [1, 1]} : vector<8x256xf32> to vector<8x128xf32>
    %204 = arith.addf %202, %203 : vector<8x128xf32>
    %c15 = arith.constant 15 : index
    %c0_83 = arith.constant 0 : index
    %205 = vector.load %arg4[%c15, %c0_83] : memref<19x128xf32, #tpu.memory_space<vmem>>, vector<1x128xf32>
    %c16 = arith.constant 16 : index
    %c0_84 = arith.constant 0 : index
    %206 = vector.load %arg4[%c16, %c0_84] : memref<19x128xf32, #tpu.memory_space<vmem>>, vector<1x128xf32>
    %cst_85 = arith.constant dense<0.000000e+00> : vector<8xf32>
    %207 = vector.multi_reduction <add>, %204, %cst_85 [1] : vector<8x128xf32> to vector<8xf32>
    %208 = vector.shape_cast %207 : vector<8xf32> to vector<8x1xf32>
    %cst_86 = arith.constant 1.280000e+02 : f32
    %209 = vector.broadcast %cst_86 : f32 to vector<8x1xf32>
    %210 = arith.divf %208, %209 : vector<8x1xf32>
    %211 = vector.broadcast %210 : vector<8x1xf32> to vector<8x128xf32>
    %212 = arith.subf %204, %211 : vector<8x128xf32>
    %213 = arith.mulf %212, %212 : vector<8x128xf32>
    %cst_87 = arith.constant dense<0.000000e+00> : vector<8xf32>
    %214 = vector.multi_reduction <add>, %213, %cst_87 [1] : vector<8x128xf32> to vector<8xf32>
    %215 = vector.shape_cast %214 : vector<8xf32> to vector<8x1xf32>
    %cst_88 = arith.constant 1.280000e+02 : f32
    %216 = vector.broadcast %cst_88 : f32 to vector<8x1xf32>
    %217 = arith.divf %215, %216 : vector<8x1xf32>
    %cst_89 = arith.constant 9.99999974E-6 : f32
    %218 = vector.broadcast %cst_89 : f32 to vector<8x1xf32>
    %219 = arith.addf %217, %218 : vector<8x1xf32>
    %220 = math.rsqrt %219 : vector<8x1xf32>
    %221 = vector.broadcast %220 : vector<8x1xf32> to vector<8x128xf32>
    %222 = arith.mulf %212, %221 : vector<8x128xf32>
    %223 = vector.broadcast %205 : vector<1x128xf32> to vector<8x128xf32>
    %224 = arith.mulf %222, %223 : vector<8x128xf32>
    %225 = vector.broadcast %206 : vector<1x128xf32> to vector<8x128xf32>
    %226 = arith.addf %224, %225 : vector<8x128xf32>
    %227 = arith.negf %226 : vector<8x128xf32>
    %228 = math.exp %227 : vector<8x128xf32>
    %cst_90 = arith.constant 1.000000e+00 : f32
    %229 = vector.broadcast %cst_90 : f32 to vector<8x128xf32>
    %230 = arith.addf %229, %228 : vector<8x128xf32>
    %231 = arith.divf %229, %230 : vector<8x128xf32>
    %232 = arith.mulf %226, %231 : vector<8x128xf32>
    %c5_91 = arith.constant 5 : index
    %c0_92 = arith.constant 0 : index
    %c0_93 = arith.constant 0 : index
    %233 = vector.load %arg5[%c5_91, %c0_92, %c0_93] : memref<7x128x128xf32, #tpu.memory_space<vmem>>, vector<1x128x128xf32>
    %234 = vector.shape_cast %233 : vector<1x128x128xf32> to vector<128x128xf32>
    %cst_94 = arith.constant dense<0.000000e+00> : vector<8x128xf32>
    %235 = tpu.matmul %232, %234, %cst_94 {dimension_numbers = #tpu.dot_dimension_numbers<[1], [0], [0], [1], [0, 0, 1, 1], [], []>} : vector<8x128xf32>, vector<128x128xf32>, vector<8x128xf32> -> vector<8x128xf32>
    %c17 = arith.constant 17 : index
    %c0_95 = arith.constant 0 : index
    %236 = vector.load %arg4[%c17, %c0_95] : memref<19x128xf32, #tpu.memory_space<vmem>>, vector<1x128xf32>
    %237 = vector.broadcast %236 : vector<1x128xf32> to vector<8x128xf32>
    %238 = arith.addf %235, %237 : vector<8x128xf32>
    %239 = arith.addf %238, %132 : vector<8x128xf32>
    %c0_96 = arith.constant 0 : index
    %c0_97 = arith.constant 0 : index
    %240 = vector.load %arg8[%c0_96, %c0_97] : memref<8x128xf32, #tpu.memory_space<vmem>>, vector<8x128xf32>
    tpu.vector_store %arg8[%c0_96, %c0_97], %239 {strides = array<i32>} : memref<8x128xf32, #tpu.memory_space<vmem>>, vector<8x128xf32>,
    return
  }
  func.func @transform_0(%arg0: i32) -> (i32, i32) {
    %c0_i32 = arith.constant 0 : i32
    %c0_i32_0 = arith.constant 0 : i32
    return %arg0, %c0_i32 : i32, i32
  }
  func.func @transform_1(%arg0: i32) -> (i32, i32) {
    %c0_i32 = arith.constant 0 : i32
    %c0_i32_0 = arith.constant 0 : i32
    return %arg0, %c0_i32 : i32, i32
  }
  func.func @transform_2(%arg0: i32) -> (i32, i32) {
    %c0_i32 = arith.constant 0 : i32
    %c0_i32_0 = arith.constant 0 : i32
    return %arg0, %c0_i32 : i32, i32
  }
  func.func @transform_3(%arg0: i32) -> (i32, i32) {
    %c0_i32 = arith.constant 0 : i32
    %c0_i32_0 = arith.constant 0 : i32
    %c0_i32_1 = arith.constant 0 : i32
    return %c0_i32, %c0_i32_0 : i32, i32
  }
  func.func @transform_4(%arg0: i32) -> (i32, i32, i32) {
    %c0_i32 = arith.constant 0 : i32
    %c0_i32_0 = arith.constant 0 : i32
    %c0_i32_1 = arith.constant 0 : i32
    %c0_i32_2 = arith.constant 0 : i32
    return %c0_i32, %c0_i32_0, %c0_i32_1 : i32, i32, i32
  }
  func.func @transform_5(%arg0: i32) -> (i32, i32) {
    %c0_i32 = arith.constant 0 : i32
    %c0_i32_0 = arith.constant 0 : i32
    %c0_i32_1 = arith.constant 0 : i32
    return %c0_i32, %c0_i32_0 : i32, i32
  }
  func.func @transform_6(%arg0: i32) -> (i32, i32) {
    %c0_i32 = arith.constant 0 : i32
    %c0_i32_0 = arith.constant 0 : i32
    %c0_i32_1 = arith.constant 0 : i32
    return %c0_i32, %c0_i32_0 : i32, i32
  }
  func.func @transform_7(%arg0: i32) -> (i32, i32) {
    %c0_i32 = arith.constant 0 : i32
    %c0_i32_0 = arith.constant 0 : i32
    return %arg0, %c0_i32 : i32, i32
  }
}

</mosaic_0001>

<bundles_post_ra>
// kernel: tpu_custom_call.1
= control target key start
LH: loop header
LB: loop body
LE: loop exit
PB: predicated region body
PF: predicated region fallthrough
CT: control target
= control target key end

     0   :  { %12 = vsyncpa [#allocation3], 0  ;;  %s1274_s0 = inlined_call_operand.hbm [shape: f32[8,128], index: 0, kind: input, shape index: {}]   ;;  %s1275_s1 = inlined_call_operand.hbm [shape: f32[8,32], index: 1, kind: input, shape index: {}]   ;;  %s1276_s2 = inlined_call_operand.hbm [shape: f32[8,16], index: 2, kind: input, shape index: {}]   ;;  %s1277_s3 = inlined_call_operand.hbm [shape: f32[19,128], index: 3, kind: input, shape index: {}]   ;;  %s1278_s4 = inlined_call_operand.hbm [shape: f32[7,128,128], index: 4, kind: input, shape index: {}]   ;;  %s1279_s5 = inlined_call_operand.hbm [shape: f32[32,256], index: 5, kind: input, shape index: {}]   ;;  %s1280_s6 = inlined_call_operand.hbm [shape: f32[16,256], index: 6, kind: input, shape index: {}]   ;;  %s1281_s7 = inlined_call_operand.hbm [shape: f32[8,128], index: 7, kind: output, shape index: {}]  }
   0x1   :  { %13 = vsyncpa [#allocation6], 0 }
   0x2   :  { %14 = vsyncpa [#allocation9], 0 }
   0x3   :  { %15 = vsyncpa [#allocation12], 0  ;;  %s33_s26 = sshll.u32 %s1275_s1, 4  ;;  %s34_s26 = int_to_ptr.hbm [resolvable:$true] %s33_s26 }
   0x4   :  { %16 = vsyncpa [#allocation4], 0  ;;  %s1148_s27 = smov [#allocation5]   ;;  %s54_s8 = sshll.u32 %s1277_s3, 4  ;;  %s55_s8 = int_to_ptr.hbm [resolvable:$true] %s54_s8 }
   0x5   :  { %s35_s28 = sshll.u32 %s1148_s27, 4  ;;  %s1149_s9 = smov [#allocation8]   ;;  %s36_s28 = int_to_ptr.vmem [resolvable:$true] %s35_s28 }
   0x6   :  { %38 = dma.hbm_to_vmem [thread:$0]  %s34_s26, 128, %s36_s28, [#allocation6]  }
   0x7   :  { %s56_s10 = sshll.u32 %s1149_s9, 4  ;;  %s1150_s11 = smov 128   ;;  %s57_s10 = int_to_ptr.vmem [resolvable:$true] %s56_s10 }
   0x8   :  { %s1151_s12 = smov 8   ;;  %s80_s14 = sshll.u32 %s1279_s5, 4  ;;  %s81_s14 = int_to_ptr.hbm [resolvable:$true] %s80_s14 }
   0x9   :  { %62 = dma.hbm_to_vmem [thread:$0]  %s55_s8, 384, %s57_s10, [#allocation9], %s1150_s11, %s1150_s11, %s1151_s12  }
   0xa   :  { %s1152_s15 = smov [#allocation11]   ;;  %s22_s18 = sshll.u32 %s1274_s0, 4  ;;  %s23_s18 = int_to_ptr.hbm [resolvable:$true] %s22_s18 }
   0xb   :  { %s82_s16 = sshll.u32 %s1152_s15, 4  ;;  %s1153_s19 = smov 256   ;;  %s83_s16 = int_to_ptr.vmem [resolvable:$true] %s82_s16 }
   0xc   :  { %s1154_s20 = smov 16   ;;  %s1155_s21 = smov [#allocation2]  }
   0xd   :  { %88 = dma.hbm_to_vmem [thread:$0]  %s81_s14, 1024, %s83_s16, [#allocation12], %s1153_s19, %s1153_s19, %s1154_s20  }
   0xe   :  { %s24_s22 = sshll.u32 %s1155_s21, 4  ;;  %s44_s25 = sshll.u32 %s1276_s2, 4  ;;  %s25_s22 = int_to_ptr.vmem [resolvable:$true] %s24_s22  ;;  %s45_s25 = int_to_ptr.hbm [resolvable:$true] %s44_s25 }
   0xf   :  { %27 = dma.hbm_to_vmem [thread:$0]  %s23_s18, 128, %s25_s22, [#allocation3]  }
  0x10   :  { %s67_s27 = sshll.u32 %s1278_s4, 4  ;;  %s1156_s28 = smov [#allocation7]   ;;  %s68_s27 = int_to_ptr.hbm [resolvable:$true] %s67_s27 }
  0x11   :  { %s46_s29 = sshll.u32 %s1156_s28, 4  ;;  %s1157_s0 = smov [#allocation10]   ;;  %s47_s29 = int_to_ptr.vmem [resolvable:$true] %s46_s29 }
  0x12   :  { %49 = dma.hbm_to_vmem [thread:$0]  %s45_s25, 128, %s47_s29, [#allocation6]  }
  0x13   :  { %s69_s30 = sshll.u32 %s1157_s0, 4  ;;  %s93_s10 = sshll.u32 %s1280_s6, 4  ;;  %s70_s30 = int_to_ptr.vmem [resolvable:$true] %s69_s30  ;;  %s94_s10 = int_to_ptr.hbm [resolvable:$true] %s93_s10 }
  0x14   :  { %75 = dma.hbm_to_vmem [thread:$0]  %s68_s27, 14336, %s70_s30, [#allocation9], %s1150_s11, %s1150_s11, %s1151_s12  }
  0x15   :  { %s1158_s2 = smov [#allocation13]  }
  0x16   :  { %s95_s1 = sshll.u32 %s1158_s2, 4  ;;  %s96_s1 = int_to_ptr.vmem [resolvable:$true] %s95_s1 }
  0x17   :  { %101 = dma.hbm_to_vmem [thread:$0]  %s94_s10, 512, %s96_s1, [#allocation12], %s1153_s19, %s1153_s19, %s1154_s20  }
  0x18   :  { %1138 = dma.done.wait [#allocation3], 128  }
  0x19   :  { %1139 = vsyncadd [#allocation3], 4294967168 }
  0x1a   :  { %1140 = dma.done.wait [#allocation6], 256  }
  0x1b   :  { %1141 = vsyncadd [#allocation6], 4294967040 }
  0x1c   :  { %1142 = dma.done.wait [#allocation9], 14720  }
  0x1d   :  { %1143 = vsyncadd [#allocation9], 4294952576 }
  0x1e   :  { %1144 = dma.done.wait [#allocation12], 1536  }
  0x1f   :  { %1145 = vsyncadd [#allocation12], 4294965760  ;;  %v1228_v0 = vld [vmem:[#allocation2] sm:$0xff]  ;;  %v1159_v1 = vmov 128.0   ;;  %v341_v12 = vld [vmem:[#allocation10 + $0x78] sm:$0xff]  ;;  %vm160_vm8 = vcmask 261120  }
  0x20   :  { %275 = vadd.xlane.f32.xlu0 %v1228_v0  ;;  %900 = vrcp.f32 %v1159_v1  ;;  %v340_v13 = vld [vmem:[#allocation10 + $0x70] sm:$0xff]  ;;  %344 = vmatpush.msra.mxu2 %v341_v12  ;;  %v339_v14 = vld [vmem:[#allocation10 + $0x68] sm:$0xff]  ;;  %v338_v15 = vld [vmem:[#allocation10 + $0x60] sm:$0xff]  ;;  %s1160_s4 = smov [#allocation14]   ;;  %s843_s13 = sshll.u32 %s1281_s7, 4  ;;  %s844_s13 = int_to_ptr.hbm [resolvable:$true] %s843_s13 }
  0x21   :  { %v337_v16 = vld [vmem:[#allocation10 + $0x58] sm:$0xff]  ;;  %v336_v17 = vld [vmem:[#allocation10 + $0x50] sm:$0xff]  ;;  %v335_v18 = vld [vmem:[#allocation10 + $0x48] sm:$0xff]  ;;  %s841_s6 = sshll.u32 %s1160_s4, 4  ;;  %s842_s6 = int_to_ptr.vmem [resolvable:$true] %s841_s6 }
  0x22   :  { %345 = vmatpush.msra.mxu2 %v340_v13  ;;  %v334_v20 = vld [vmem:[#allocation10 + $0x40] sm:$0xff]  ;;  %v333_v22 = vld [vmem:[#allocation10 + $0x38] sm:$0xff]  ;;  %v332_v24 = vld [vmem:[#allocation10 + $0x30] sm:$0xff] }
  0x23   :  { %v131_v25 = vld [vmem:[#allocation5] sm:$0xff]  ;;  %v331_v27 = vld [vmem:[#allocation10 + $0x28] sm:$0xff]  ;;  %v330_v28 = vld [vmem:[#allocation10 + $0x20] sm:$0xff] }
  0x24   :  { %346 = vmatpush.msra.mxu2 %v339_v14  ;;  %v856_v26 = vmul.f32 -1.442695, %v131_v25  ;;  %v329_v29 = vld [vmem:[#allocation10 + $0x18] sm:$0xff]  ;;  %v328_v32 = vld [vmem:[#allocation10 + $0x10] sm:$0xff]  ;;  %v327_v35 = vld [vmem:[#allocation10 + $0x8] sm:$0xff] }
  0x25   :  { %v326_v38 = vld [vmem:[#allocation10] sm:$0xff]  ;;  %v881_v41 = vld [vmem:[#allocation8] ss:$0 sm:$0xff]  ;;  %v882_v45 = vld [vmem:[#allocation8 + $0x1] ss:$0 sm:$0xff] }
  0x26   :  { %v901_v2 = vpop.eup %900  ;;  %347 = vmatpush.msra.mxu2 %v338_v15  ;;  %v158_v50 = vld [vmem:[#allocation11 + $0x30] sm:$0xff]  ;;  %v156_v51 = vld [vmem:[#allocation11 + $0x20] sm:$0xff]  ;;  %v883_v14 = vld [vmem:[#allocation8 + $0x2] ss:$0 sm:$0xff] }
  0x27   :  { %v278_v3 = vmul.f32 128.0, %v901_v2  ;;  %vm282_vm0 = vweird.f32 %v901_v2  ;;  %176 = vmatpush.msra.mxu1 %v158_v50  ;;  %v154_v56 = vld [vmem:[#allocation11 + $0x10] sm:$0xff]  ;;  %v152_v59 = vld [vmem:[#allocation11] sm:$0xff] }
  0x28   :  { %348 = vmatpush.msra.mxu2 %v337_v16 }
  0x29   :  { %v279_v4 = vsub.f32 1.0, %v278_v3  ;;  %177 = vmatpush.msra.mxu1 %v156_v51  ;;  %v413_v51 = vld [vmem:[#allocation10 + $0x88] sm:$0xff] }
  0x2a   :  { %349 = vmatpush.msra.mxu2 %v336_v17 }
  0x2b   :  { %v280_v5 = vmul.f32 %v901_v2, %v279_v4  ;;  %178 = vmatpush.msra.mxu1 %v154_v56 }
  0x2c   :  { %350 = vmatpush.msra.mxu2 %v335_v18 }
  0x2d   :  { %v281_v6 = vadd.f32 %v901_v2, %v280_v5  ;;  %179 = vmatpush.msra.mxu1 %v152_v59 }
  0x2e   :  { %351 = vmatpush.msra.mxu2 %v334_v20 }
  0x2f   :  { %v1231_v7 = vsel %vm282_vm0, %v901_v2, %v281_v6 }
  0x30   :  { %352 = vmatpush.msra.mxu2 %v333_v22 }
  0x32   :  { %353 = vmatpush.msra.mxu2 %v332_v24  ;;  %v426_v24 = vld [vmem:[#allocation10 + $0xf0] sm:$0xff] }
  0x34   :  { %354 = vmatpush.msra.mxu2 %v331_v27  ;;  %v159_v27 = vld [vmem:[#allocation11 + $0x38] sm:$0xff] }
  0x35   :  { %196 = vmatpush.msrb.mxu1 %v159_v27 }
  0x36   :  { %355 = vmatpush.msra.mxu2 %v330_v28  ;;  %v157_v28 = vld [vmem:[#allocation11 + $0x28] sm:$0xff] }
  0x37   :  { %197 = vmatpush.msrb.mxu1 %v157_v28  ;;  %v886_v28 = vld [vmem:[#allocation8 + $0x5] ss:$0 sm:$0xff] }
  0x38   :  { %356 = vmatpush.msra.mxu2 %v329_v29  ;;  %v423_v29 = vld [vmem:[#allocation10 + $0xd8] sm:$0xff] }
  0x3a   :  { %357 = vmatpush.msra.mxu2 %v328_v32  ;;  %v153_v32 = vld [vmem:[#allocation11 + $0x8] sm:$0xff] }
  0x3c   :  { %358 = vmatpush.msra.mxu2 %v327_v35 }
  0x3e   :  { %359 = vmatpush.msra.mxu2 %v326_v38  ;;  %v419_v38 = vld [vmem:[#allocation10 + $0xb8] sm:$0xff] }
  0x93   :  { %v276_v8 = vpop.xlane.xlu0 %275 }
  0x94   :  { %v284_v9 = vmul.f32 %v1231_v7, %v276_v8 }
  0x96   :  { %v285_v10 = vsub.f32 %v1228_v0, %v284_v9 }
  0x98   :  { %v286_v11 = vmul.f32 %v285_v10, %v285_v10 }
  0x9a   :  { %287 = vadd.xlane.f32.xlu0 %v286_v11 }
 0x10d   :  { %v288_v19 = vpop.xlane.xlu0 %287 }
 0x10e   :  { %v289_v21 = vmul.f32 %v288_v19, %v1231_v7 }
 0x110   :  { %v290_v23 = vadd.f32 1e-05, %v289_v21 }
 0x112   :  { %902 = vrsqrt.f32 %v290_v23  ;;  %vm297_vm2 = vweird.f32 %v290_v23 }
 0x113   :  { %904 = vpow2.f32 %v856_v26  ;;  %v424_v26 = vld [vmem:[#allocation10 + $0xe0] sm:$0xff] }
 0x118   :  { %v903_v30 = vpop.eup %902 }
 0x119   :  { %v292_v31 = vmul.f32 %v903_v30, %v290_v23  ;;  %v905_v33 = vpop.eup %904  ;;  %vm298_vm1 = vweird.f32 %v903_v30  ;;  %v427_v23 = vld [vmem:[#allocation10 + $0xf8] sm:$0xff] }
 0x11a   :  { %v135_v36 = vadd.f32 1.0, %v905_v33  ;;  %vm299_vm3 = vmor %vm297_vm2, %vm298_vm1  ;;  %430 = vmatpush.msra.mxu3 %v427_v23  ;;  %v421_v33 = vld [vmem:[#allocation10 + $0xc8] sm:$0xff] }
 0x11b   :  { %v293_v34 = vmul.f32 %v903_v30, %v292_v31  ;;  %v422_v31 = vld [vmem:[#allocation10 + $0xd0] sm:$0xff] }
 0x11c   :  { %906 = vrcp.f32 %v135_v36  ;;  %vm141_vm4 = vweird.f32 %v135_v36  ;;  %v145_v53 = vand.u32 2147483647, %v135_v36  ;;  %v147_v54 = vand.u32 2147483648, %v135_v36  ;;  %431 = vmatpush.msra.mxu3 %v426_v24 }
 0x11d   :  { %v294_v37 = vmul.f32 0.5, %v293_v34  ;;  %v227_v34 = vld [vmem:[#allocation13 + $0x10] sm:$0xff] }
 0x11e   :  { %vm146_vm7 = vcmp.eq.f32.partialorder %v145_v53, 8.507059e+37  ;;  %v148_v58 = vor.u32 1.1754944e-38, %v147_v54  ;;  %v412_v54 = vld [vmem:[#allocation10 + $0x80] sm:$0xff] }
 0x11f   :  { %v295_v39 = vsub.f32 1.5, %v294_v37 }
 0x121   :  { %v296_v40 = vmul.f32 %v903_v30, %v295_v39 }
 0x122   :  { %v907_v42 = vpop.eup %906 }
 0x123   :  { %v300_v43 = vsel %vm299_vm3, %v903_v30, %v296_v40  ;;  %v137_v46 = vmul.f32 %v907_v42, %v135_v36  ;;  %vm142_vm5 = vweird.f32 %v907_v42  ;;  %v155_v30 = vld [vmem:[#allocation11 + $0x18] sm:$0xff]  ;;  %v420_v36 = vld [vmem:[#allocation10 + $0xc0] sm:$0xff]  ;;  %v418_v40 = vld [vmem:[#allocation10 + $0xb0] sm:$0xff] }
 0x124   :  { %v301_v44 = vmul.f32 %v300_v43, %v285_v10  ;;  %vm143_vm6 = vmor %vm141_vm4, %vm142_vm5  ;;  %198 = vmatpush.msrb.mxu1 %v155_v30  ;;  %v417_v43 = vld [vmem:[#allocation10 + $0xa8] sm:$0xff]  ;;  %vm229_vm4 = vcmask 130048  }
 0x125   :  { %v138_v48 = vsub.f32 1.0, %v137_v46 }
 0x126   :  { %v303_v47 = vmul.f32 %v881_v41, %v301_v44  ;;  %199 = vmatpush.msrb.mxu1 %v153_v32  ;;  %v204_v41 = vld [vmem:[#allocation7] sm:$0xff] }
 0x127   :  { %v139_v52 = vmul.f32 %v907_v42, %v138_v48  ;;  %v416_v44 = vld [vmem:[#allocation10 + $0xa0] sm:$0xff]  ;;  %v414_v48 = vld [vmem:[#allocation10 + $0x90] sm:$0xff] }
 0x128   :  { %v305_v49 = vadd.f32 %v882_v45, %v303_v47  ;;  %v415_v45 = vld [vmem:[#allocation10 + $0x98] sm:$0xff] }
 0x129   :  { %v140_v57 = vadd.f32 %v907_v42, %v139_v52 }
 0x12a   :  { %v862_v55 = vmul.f32 -1.442695, %v305_v49 }
 0x12b   :  { %v144_v60 = vsel %vm143_vm6, %v907_v42, %v140_v57  ;;  %v859_v42 = vmul.f32 -1.442695, %v204_v41  ;;  %v884_v57 = vld [vmem:[#allocation8 + $0x3] ss:$0 sm:$0xff] }
 0x12c   :  { %908 = vpow2.f32 %v862_v55  ;;  %v149_v61 = vsel %vm146_vm7, %v148_v58, %v144_v60 }
 0x12d   :  { %v151_v62 = vmul.f32 %v149_v61, %v131_v25  ;;  %v425_v25 = vld [vmem:[#allocation10 + $0xe8] sm:$0xff] }
 0x12e   :  { %432 = vmatpush.msra.mxu3 %v425_v25  ;;  %v885_v61 = vld [vmem:[#allocation8 + $0x4] ss:$0 sm:$0xff] }
 0x12f   :  { %857 = vmatmul.msk.f32.vlgmr.msra.gmra.mxu1 %vm160_vm8, %v151_v62 }
 0x130   :  { %433 = vmatpush.msra.mxu3 %v424_v26  ;;  %247 = vmatpush.msra.mxu1 %v227_v34 }
 0x132   :  { %v909_v63 = vpop.eup %908  ;;  %434 = vmatpush.msra.mxu3 %v423_v29 }
 0x133   :  { %v309_v1 = vadd.f32 1.0, %v909_v63 }
 0x134   :  { %435 = vmatpush.msra.mxu3 %v422_v31 }
 0x135   :  { %910 = vrcp.f32 %v309_v1  ;;  %v321_v5 = vand.u32 2147483648, %v309_v1  ;;  %v319_v8 = vand.u32 2147483647, %v309_v1  ;;  %vm315_vm10 = vweird.f32 %v309_v1 }
 0x136   :  { %436 = vmatpush.msra.mxu3 %v421_v33 }
 0x137   :  { %v322_v10 = vor.u32 1.1754944e-38, %v321_v5  ;;  %vm320_vm12 = vcmp.eq.f32.partialorder %v319_v8, 8.507059e+37  ;;  %858 = vmatmul.msk.f32.vlgmr.msrb.gmra.mxu1 %vm160_vm8, %v151_v62 }
 0x138   :  { %437 = vmatpush.msra.mxu3 %v420_v36 }
 0x13a   :  { %438 = vmatpush.msra.mxu3 %v419_v38  ;;  %v512_v38 = vld [vmem:[#allocation10 + $0x170] sm:$0xff] }
 0x13b   :  { %v911_v2 = vpop.eup %910 }
 0x13c   :  { %v311_v3 = vmul.f32 %v911_v2, %v309_v1  ;;  %vm316_vm9 = vweird.f32 %v911_v2  ;;  %439 = vmatpush.msra.mxu3 %v418_v40  ;;  %v510_v40 = vld [vmem:[#allocation10 + $0x160] sm:$0xff] }
 0x13d   :  { %vm317_vm11 = vmor %vm315_vm10, %vm316_vm9 }
 0x13e   :  { %v312_v4 = vsub.f32 1.0, %v311_v3  ;;  %440 = vmatpush.msra.mxu3 %v417_v43  ;;  %v225_v3 = vld [vmem:[#allocation13] sm:$0xff]  ;;  %v507_v43 = vld [vmem:[#allocation10 + $0x148] sm:$0xff] }
 0x13f   :  { %248 = vmatpush.msra.mxu1 %v225_v3 }
 0x140   :  { %v313_v6 = vmul.f32 %v911_v2, %v312_v4  ;;  %441 = vmatpush.msra.mxu3 %v416_v44 }
 0x142   :  { %v314_v9 = vadd.f32 %v911_v2, %v313_v6  ;;  %442 = vmatpush.msra.mxu3 %v415_v45  ;;  %v506_v45 = vld [vmem:[#allocation10 + $0x140] sm:$0xff] }
 0x144   :  { %v318_v11 = vsel %vm317_vm11, %v911_v2, %v314_v9  ;;  %443 = vmatpush.msra.mxu3 %v414_v48 }
 0x145   :  { %v323_v12 = vsel %vm320_vm12, %v322_v10, %v318_v11 }
 0x146   :  { %v325_v13 = vmul.f32 %v323_v12, %v305_v49  ;;  %444 = vmatpush.msra.mxu3 %v413_v51  ;;  %v502_v51 = vld [vmem:[#allocation10 + $0x120] sm:$0xff] }
 0x148   :  { %360 = vmatmul.f32.vlgmr.msra.gmra.mxu2 %v325_v13  ;;  %445 = vmatpush.msra.mxu3 %v412_v54 }
 0x1ac   :  { %v181_v16 = vpop.f32.mrf.mxu1 }
 0x1b4   :  { %v1249_v27 = vpop.f32.mrf.mxu1 }
 0x1cb   :  { %v361_v15 = vpop.f32.mrf.mxu2 }
 0x1cc   :  { %v362_v17 = vadd.f32 %v883_v14, %v361_v15 }
 0x1ce   :  { %v364_v18 = vadd.f32 %v362_v17, %v181_v16 }
 0x1d0   :  { %367 = vadd.xlane.f32.xlu1 %v364_v18 }
 0x243   :  { %v368_v19 = vpop.xlane.xlu1 %367 }
 0x244   :  { %v369_v20 = vmul.f32 %v368_v19, %v1231_v7 }
 0x246   :  { %v1238_v21 = vsub.f32 %v364_v18, %v369_v20 }
 0x248   :  { %v371_v22 = vmul.f32 %v1238_v21, %v1238_v21 }
 0x24a   :  { %372 = vadd.xlane.f32.xlu1 %v371_v22 }
 0x2bd   :  { %v373_v35 = vpop.xlane.xlu1 %372 }
 0x2be   :  { %v374_v37 = vmul.f32 %v373_v35, %v1231_v7 }
 0x2c0   :  { %v375_v39 = vadd.f32 1e-05, %v374_v37  ;;  %v513_v37 = vld [vmem:[#allocation10 + $0x178] sm:$0xff] }
 0x2c1   :  { %516 = vmatpush.msra.mxu0 %v513_v37  ;;  %v539_v37 = vld [vmem:[#allocation10 + $0x308] sm:$0xff] }
 0x2c2   :  { %912 = vrsqrt.f32 %v375_v39  ;;  %vm382_vm14 = vweird.f32 %v375_v39 }
 0x2c3   :  { %914 = vpow2.f32 %v859_v42  ;;  %517 = vmatpush.msra.mxu0 %v512_v38  ;;  %v508_v42 = vld [vmem:[#allocation10 + $0x150] sm:$0xff]  ;;  %v538_v38 = vld [vmem:[#allocation10 + $0x300] sm:$0xff] }
 0x2c8   :  { %v913_v46 = vpop.eup %912 }
 0x2c9   :  { %v377_v47 = vmul.f32 %v913_v46, %v375_v39  ;;  %v915_v49 = vpop.eup %914  ;;  %vm383_vm13 = vweird.f32 %v913_v46  ;;  %v511_v39 = vld [vmem:[#allocation10 + $0x168] sm:$0xff] }
 0x2ca   :  { %v208_v52 = vadd.f32 1.0, %v915_v49  ;;  %vm384_vm15 = vmor %vm382_vm14, %vm383_vm13  ;;  %518 = vmatpush.msra.mxu0 %v511_v39  ;;  %v504_v49 = vld [vmem:[#allocation10 + $0x130] sm:$0xff] }
 0x2cb   :  { %v378_v50 = vmul.f32 %v913_v46, %v377_v47  ;;  %v505_v47 = vld [vmem:[#allocation10 + $0x138] sm:$0xff]  ;;  %v889_v39 = vld [vmem:[#allocation8 + $0x8] ss:$0 sm:$0xff] }
 0x2cc   :  { %916 = vrcp.f32 %v208_v52  ;;  %vm214_vm0 = vweird.f32 %v208_v52  ;;  %v218_v5 = vand.u32 2147483647, %v208_v52  ;;  %v220_v6 = vand.u32 2147483648, %v208_v52  ;;  %519 = vmatpush.msra.mxu0 %v510_v40 }
 0x2cd   :  { %v379_v53 = vmul.f32 0.5, %v378_v50  ;;  %v503_v50 = vld [vmem:[#allocation10 + $0x128] sm:$0xff] }
 0x2ce   :  { %vm219_vm3 = vcmp.eq.f32.partialorder %v218_v5, 8.507059e+37  ;;  %v221_v10 = vor.u32 1.1754944e-38, %v220_v6  ;;  %v228_v5 = vld [vmem:[#allocation13 + $0x18] sm:$0xff]  ;;  %v226_v6 = vld [vmem:[#allocation13 + $0x8] sm:$0xff] }
 0x2cf   :  { %v380_v55 = vsub.f32 1.5, %v379_v53  ;;  %267 = vmatpush.msrb.mxu1 %v228_v5  ;;  %v627_v5 = vld [vmem:[#allocation10 + $0x198] sm:$0xff] }
 0x2d1   :  { %v381_v56 = vmul.f32 %v913_v46, %v380_v55  ;;  %v500_v55 = vld [vmem:[#allocation10 + $0x110] sm:$0xff]  ;;  %268 = vmatpush.msrb.mxu1 %v226_v6 }
 0x2d2   :  { %v917_v58 = vpop.eup %916 }
 0x2d3   :  { %v385_v59 = vsel %vm384_vm15, %v913_v46, %v381_v56  ;;  %v210_v62 = vmul.f32 %v917_v58, %v208_v52  ;;  %vm215_vm1 = vweird.f32 %v917_v58  ;;  %v501_v52 = vld [vmem:[#allocation10 + $0x118] sm:$0xff] }
 0x2d4   :  { %v386_v60 = vmul.f32 %v385_v59, %v1238_v21  ;;  %vm216_vm2 = vmor %vm214_vm0, %vm215_vm1  ;;  %v498_v59 = vld [vmem:[#allocation10 + $0x100] sm:$0xff] }
 0x2d5   :  { %v211_v1 = vsub.f32 1.0, %v210_v62  ;;  %v887_v62 = vld [vmem:[#allocation8 + $0x6] ss:$0 sm:$0xff] }
 0x2d6   :  { %v388_v63 = vmul.f32 %v884_v57, %v386_v60  ;;  %v499_v57 = vld [vmem:[#allocation10 + $0x108] sm:$0xff] }
 0x2d7   :  { %v212_v4 = vmul.f32 %v917_v58, %v211_v1 }
 0x2d8   :  { %v390_v2 = vadd.f32 %v885_v61, %v388_v63 }
 0x2d9   :  { %v213_v9 = vadd.f32 %v917_v58, %v212_v4 }
 0x2da   :  { %v863_v8 = vmul.f32 -1.442695, %v390_v2 }
 0x2db   :  { %v217_v11 = vsel %vm216_vm2, %v917_v58, %v213_v9 }
 0x2dc   :  { %918 = vpow2.f32 %v863_v8  ;;  %v222_v12 = vsel %vm219_vm3, %v221_v10, %v217_v11  ;;  %v553_v8 = vld [vmem:[#allocation10 + $0x378] sm:$0xff]  ;;  %v552_v10 = vld [vmem:[#allocation10 + $0x370] sm:$0xff]  ;;  %v551_v11 = vld [vmem:[#allocation10 + $0x368] sm:$0xff] }
 0x2dd   :  { %v1245_v13 = vmul.f32 %v222_v12, %v204_v41  ;;  %v509_v41 = vld [vmem:[#allocation10 + $0x158] sm:$0xff]  ;;  %v550_v12 = vld [vmem:[#allocation10 + $0x360] sm:$0xff] }
 0x2de   :  { %520 = vmatpush.msra.mxu0 %v509_v41 }
 0x2df   :  { %860 = vmatmul.msk.f32.vlgmr.msra.gmra.mxu1 %vm229_vm4, %v1245_v13 }
 0x2e0   :  { %521 = vmatpush.msra.mxu0 %v508_v42  ;;  %556 = vmatpush.msra.mxu1 %v553_v8  ;;  %v626_v8 = vld [vmem:[#allocation10 + $0x190] sm:$0xff] }
 0x2e2   :  { %v919_v14 = vpop.eup %918  ;;  %522 = vmatpush.msra.mxu0 %v507_v43  ;;  %557 = vmatpush.msra.mxu1 %v552_v10  ;;  %v625_v10 = vld [vmem:[#allocation10 + $0x188] sm:$0xff] }
 0x2e3   :  { %v394_v15 = vadd.f32 1.0, %v919_v14  ;;  %v549_v14 = vld [vmem:[#allocation10 + $0x358] sm:$0xff] }
 0x2e4   :  { %523 = vmatpush.msra.mxu0 %v506_v45  ;;  %558 = vmatpush.msra.mxu1 %v551_v11 }
 0x2e5   :  { %920 = vrcp.f32 %v394_v15  ;;  %v406_v19 = vand.u32 2147483648, %v394_v15  ;;  %v404_v21 = vand.u32 2147483647, %v394_v15  ;;  %vm400_vm6 = vweird.f32 %v394_v15 }
 0x2e6   :  { %524 = vmatpush.msra.mxu0 %v505_v47  ;;  %559 = vmatpush.msra.mxu1 %v550_v12  ;;  %v624_v12 = vld [vmem:[#allocation10 + $0x180] sm:$0xff] }
 0x2e7   :  { %v407_v23 = vor.u32 1.1754944e-38, %v406_v19  ;;  %vm405_vm8 = vcmp.eq.f32.partialorder %v404_v21, 8.507059e+37  ;;  %861 = vmatmul.msk.f32.vlgmr.msrb.gmra.mxu1 %vm229_vm4, %v1245_v13  ;;  %v546_v19 = vld [vmem:[#allocation10 + $0x340] sm:$0xff]  ;;  %v543_v13 = vld [vmem:[#allocation10 + $0x328] sm:$0xff] }
 0x2e8   :  { %525 = vmatpush.msra.mxu0 %v504_v49  ;;  %560 = vmatpush.msra.mxu1 %v549_v14 }
 0x2ea   :  { %526 = vmatpush.msra.mxu0 %v503_v50 }
 0x2eb   :  { %v921_v16 = vpop.eup %920 }
 0x2ec   :  { %v396_v17 = vmul.f32 %v921_v16, %v394_v15  ;;  %vm401_vm5 = vweird.f32 %v921_v16  ;;  %527 = vmatpush.msra.mxu0 %v502_v51 }
 0x2ed   :  { %vm402_vm7 = vmor %vm400_vm6, %vm401_vm5 }
 0x2ee   :  { %v397_v18 = vsub.f32 1.0, %v396_v17  ;;  %528 = vmatpush.msra.mxu0 %v501_v52  ;;  %v548_v17 = vld [vmem:[#allocation10 + $0x350] sm:$0xff]  ;;  %v639_v52 = vld [vmem:[#allocation10 + $0x1f8] sm:$0xff] }
 0x2ef   :  { %561 = vmatpush.msra.mxu1 %v548_v17  ;;  %642 = vmatpush.msrb.mxu2 %v639_v52  ;;  %v719_v52 = vld [vmem:[#allocation10 + $0x248] sm:$0xff] }
 0x2f0   :  { %v398_v20 = vmul.f32 %v921_v16, %v397_v18  ;;  %529 = vmatpush.msra.mxu0 %v500_v55  ;;  %v547_v18 = vld [vmem:[#allocation10 + $0x348] sm:$0xff]  ;;  %v635_v55 = vld [vmem:[#allocation10 + $0x1d8] sm:$0xff] }
 0x2f1   :  { %562 = vmatpush.msra.mxu1 %v547_v18  ;;  %v892_v18 = vld [vmem:[#allocation8 + $0xa] ss:$0 sm:$0xff] }
 0x2f2   :  { %v399_v22 = vadd.f32 %v921_v16, %v398_v20  ;;  %530 = vmatpush.msra.mxu0 %v499_v57  ;;  %v545_v20 = vld [vmem:[#allocation10 + $0x338] sm:$0xff] }
 0x2f3   :  { %563 = vmatpush.msra.mxu1 %v546_v19 }
 0x2f4   :  { %v403_v24 = vsel %vm402_vm7, %v921_v16, %v399_v22  ;;  %531 = vmatpush.msra.mxu0 %v498_v59  ;;  %v544_v22 = vld [vmem:[#allocation10 + $0x330] sm:$0xff]  ;;  %v633_v59 = vld [vmem:[#allocation10 + $0x1c8] sm:$0xff] }
 0x2f5   :  { %v408_v25 = vsel %vm405_vm8, %v407_v23, %v403_v24  ;;  %564 = vmatpush.msra.mxu1 %v545_v20 }
 0x2f6   :  { %v410_v26 = vmul.f32 %v408_v25, %v390_v2  ;;  %v888_v2 = vld [vmem:[#allocation8 + $0x7] ss:$0 sm:$0xff] }
 0x2f7   :  { %565 = vmatpush.msra.mxu1 %v544_v22 }
 0x2f8   :  { %446 = vmatmul.f32.vlgmr.msra.gmra.mxu3 %v410_v26  ;;  %v542_v26 = vld [vmem:[#allocation10 + $0x320] sm:$0xff] }
 0x2f9   :  { %566 = vmatpush.msra.mxu1 %v543_v13 }
 0x2fb   :  { %567 = vmatpush.msra.mxu1 %v542_v26 }
 0x35c   :  { %v250_v30 = vpop.f32.mrf.mxu1 }
 0x364   :  { %v1256_v43 = vpop.f32.mrf.mxu1 }
 0x37b   :  { %v447_v29 = vpop.f32.mrf.mxu3 }
 0x37c   :  { %v448_v31 = vadd.f32 %v886_v28, %v447_v29 }
 0x37e   :  { %v450_v32 = vadd.f32 %v448_v31, %v250_v30  ;;  %v541_v30 = vld [vmem:[#allocation10 + $0x318] sm:$0xff] }
 0x37f   :  { %568 = vmatpush.msra.mxu1 %v541_v30 }
 0x380   :  { %453 = vadd.xlane.f32.xlu2 %v450_v32 }
 0x3f3   :  { %v454_v33 = vpop.xlane.xlu2 %453 }
 0x3f4   :  { %v455_v34 = vmul.f32 %v454_v33, %v1231_v7 }
 0x3f6   :  { %v456_v35 = vsub.f32 %v450_v32, %v455_v34 }
 0x3f8   :  { %v457_v36 = vmul.f32 %v456_v35, %v456_v35 }
 0x3fa   :  { %458 = vadd.xlane.f32.xlu2 %v457_v36  ;;  %v540_v36 = vld [vmem:[#allocation10 + $0x310] sm:$0xff] }
 0x3fb   :  { %569 = vmatpush.msra.mxu1 %v540_v36 }
 0x3fd   :  { %570 = vmatpush.msra.mxu1 %v539_v37 }
 0x3ff   :  { %571 = vmatpush.msra.mxu1 %v538_v38 }
 0x46d   :  { %v459_v44 = vpop.xlane.xlu2 %458 }
 0x46e   :  { %v460_v46 = vmul.f32 %v459_v44, %v1231_v7  ;;  %v890_v44 = vld [vmem:[#allocation8 + $0x12] ss:$0 sm:$0xff] }
 0x470   :  { %v461_v48 = vadd.f32 1e-05, %v460_v46 }
 0x472   :  { %922 = vrsqrt.f32 %v461_v48  ;;  %vm468_vm10 = vweird.f32 %v461_v48 }
 0x478   :  { %v923_v53 = vpop.eup %922 }
 0x479   :  { %v463_v54 = vmul.f32 %v923_v53, %v461_v48  ;;  %vm469_vm9 = vweird.f32 %v923_v53 }
 0x47a   :  { %vm470_vm11 = vmor %vm468_vm10, %vm469_vm9 }
 0x47b   :  { %v464_v56 = vmul.f32 %v923_v53, %v463_v54  ;;  %v636_v54 = vld [vmem:[#allocation10 + $0x1e0] sm:$0xff] }
 0x47d   :  { %v465_v58 = vmul.f32 0.5, %v464_v56  ;;  %v634_v56 = vld [vmem:[#allocation10 + $0x1d0] sm:$0xff] }
 0x47f   :  { %v466_v60 = vsub.f32 1.5, %v465_v58 }
 0x481   :  { %v467_v61 = vmul.f32 %v923_v53, %v466_v60 }
 0x483   :  { %v471_v63 = vsel %vm470_vm11, %v923_v53, %v467_v61  ;;  %v638_v53 = vld [vmem:[#allocation10 + $0x1f0] sm:$0xff]  ;;  %v632_v61 = vld [vmem:[#allocation10 + $0x1c0] sm:$0xff] }
 0x484   :  { %v472_v1 = vmul.f32 %v471_v63, %v456_v35  ;;  %643 = vmatpush.msrb.mxu2 %v638_v53  ;;  %v630_v63 = vld [vmem:[#allocation10 + $0x1b0] sm:$0xff] }
 0x486   :  { %v474_v3 = vmul.f32 %v887_v62, %v472_v1  ;;  %v631_v62 = vld [vmem:[#allocation10 + $0x1b8] sm:$0xff]  ;;  %v629_v1 = vld [vmem:[#allocation10 + $0x1a8] sm:$0xff] }
 0x488   :  { %v476_v4 = vadd.f32 %v888_v2, %v474_v3  ;;  %v628_v3 = vld [vmem:[#allocation10 + $0x1a0] sm:$0xff] }
 0x48a   :  { %v864_v9 = vmul.f32 -1.442695, %v476_v4 }
 0x48c   :  { %924 = vpow2.f32 %v864_v9 }
 0x492   :  { %v925_v15 = vpop.eup %924 }
 0x493   :  { %v480_v16 = vadd.f32 1.0, %v925_v15  ;;  %v891_v15 = vld [vmem:[#allocation8 + $0x9] ss:$0 sm:$0xff] }
 0x495   :  { %926 = vrcp.f32 %v480_v16  ;;  %v492_v25 = vand.u32 2147483648, %v480_v16  ;;  %v490_v29 = vand.u32 2147483647, %v480_v16  ;;  %vm486_vm13 = vweird.f32 %v480_v16 }
 0x497   :  { %v493_v32 = vor.u32 1.1754944e-38, %v492_v25  ;;  %vm491_vm15 = vcmp.eq.f32.partialorder %v490_v29, 8.507059e+37 }
 0x49b   :  { %v927_v21 = vpop.eup %926 }
 0x49c   :  { %v482_v23 = vmul.f32 %v927_v21, %v480_v16  ;;  %vm487_vm12 = vweird.f32 %v927_v21 }
 0x49d   :  { %vm488_vm14 = vmor %vm486_vm13, %vm487_vm12 }
 0x49e   :  { %v483_v24 = vsub.f32 1.0, %v482_v23 }
 0x4a0   :  { %v484_v28 = vmul.f32 %v927_v21, %v483_v24 }
 0x4a2   :  { %v485_v31 = vadd.f32 %v927_v21, %v484_v28 }
 0x4a4   :  { %v489_v33 = vsel %vm488_vm14, %v927_v21, %v485_v31 }
 0x4a5   :  { %v494_v34 = vsel %vm491_vm15, %v493_v32, %v489_v33 }
 0x4a6   :  { %v496_v35 = vmul.f32 %v494_v34, %v476_v4 }
 0x4a8   :  { %532 = vmatmul.f32.vlgmr.msra.gmra.mxu0 %v496_v35  ;;  %v893_v35 = vld [vmem:[#allocation8 + $0xb] ss:$0 sm:$0xff] }
 0x525   :  { %v533_v40 = vpop.f32.mrf.mxu0 }
 0x526   :  { %v534_v41 = vadd.f32 %v889_v39, %v533_v40 }
 0x528   :  { %v536_v42 = vadd.f32 %v534_v41, %v1228_v0  ;;  %v637_v0 = vld [vmem:[#allocation10 + $0x1e8] sm:$0xff] }
 0x529   :  { %644 = vmatpush.msrb.mxu2 %v637_v0  ;;  %v718_v0 = vld [vmem:[#allocation10 + $0x240] sm:$0xff] }
 0x52a   :  { %572 = vmatmul.f32.vlgmr.msra.gmra.mxu1 %v536_v42 }
 0x52b   :  { %645 = vmatpush.msrb.mxu2 %v636_v54  ;;  %v717_v54 = vld [vmem:[#allocation10 + $0x238] sm:$0xff] }
 0x52d   :  { %646 = vmatpush.msrb.mxu2 %v635_v55  ;;  %v716_v55 = vld [vmem:[#allocation10 + $0x230] sm:$0xff] }
 0x52f   :  { %647 = vmatpush.msrb.mxu2 %v634_v56  ;;  %v715_v56 = vld [vmem:[#allocation10 + $0x228] sm:$0xff] }
 0x531   :  { %648 = vmatpush.msrb.mxu2 %v633_v59 }
 0x533   :  { %649 = vmatpush.msrb.mxu2 %v632_v61 }
 0x535   :  { %650 = vmatpush.msrb.mxu2 %v631_v62  ;;  %v712_v62 = vld [vmem:[#allocation10 + $0x210] sm:$0xff] }
 0x537   :  { %651 = vmatpush.msrb.mxu2 %v630_v63 }
 0x539   :  { %652 = vmatpush.msrb.mxu2 %v629_v1  ;;  %v711_v1 = vld [vmem:[#allocation10 + $0x208] sm:$0xff] }
 0x53b   :  { %653 = vmatpush.msrb.mxu2 %v628_v3  ;;  %v710_v3 = vld [vmem:[#allocation10 + $0x200] sm:$0xff] }
 0x53d   :  { %654 = vmatpush.msrb.mxu2 %v627_v5  ;;  %v894_v5 = vld [vmem:[#allocation8 + $0xc] ss:$0 sm:$0xff] }
 0x53f   :  { %655 = vmatpush.msrb.mxu2 %v626_v8 }
 0x541   :  { %656 = vmatpush.msrb.mxu2 %v625_v10 }
 0x543   :  { %657 = vmatpush.msrb.mxu2 %v624_v12 }
 0x5a7   :  { %v573_v45 = vpop.f32.mrf.mxu1 }
 0x5a8   :  { %v574_v46 = vadd.f32 %v890_v44, %v573_v45  ;;  %v725_v44 = vld [vmem:[#allocation10 + $0x278] sm:$0xff]  ;;  %v724_v45 = vld [vmem:[#allocation10 + $0x270] sm:$0xff] }
 0x5a9   :  { %728 = vmatpush.msrb.mxu3 %v725_v44 }
 0x5aa   :  { %v1258_v47 = vadd.f32 %v574_v46, %v536_v42  ;;  %v723_v46 = vld [vmem:[#allocation10 + $0x268] sm:$0xff] }
 0x5ab   :  { %729 = vmatpush.msrb.mxu3 %v724_v45  ;;  %v804_v45 = vld [vmem:[#allocation10 + $0x2c0] sm:$0xff] }
 0x5ac   :  { %579 = vadd.xlane.f32.xlu0 %v1258_v47 }
 0x5ad   :  { %730 = vmatpush.msrb.mxu3 %v723_v46  ;;  %v803_v46 = vld [vmem:[#allocation10 + $0x2b8] sm:$0xff] }
 0x61f   :  { %v580_v48 = vpop.xlane.xlu0 %579 }
 0x620   :  { %v581_v49 = vmul.f32 %v580_v48, %v1231_v7  ;;  %v722_v48 = vld [vmem:[#allocation10 + $0x260] sm:$0xff] }
 0x621   :  { %731 = vmatpush.msrb.mxu3 %v722_v48  ;;  %v802_v48 = vld [vmem:[#allocation10 + $0x2b0] sm:$0xff] }
 0x622   :  { %v582_v50 = vsub.f32 %v1258_v47, %v581_v49  ;;  %v721_v49 = vld [vmem:[#allocation10 + $0x258] sm:$0xff] }
 0x623   :  { %732 = vmatpush.msrb.mxu3 %v721_v49  ;;  %v801_v49 = vld [vmem:[#allocation10 + $0x2a8] sm:$0xff] }
 0x624   :  { %v583_v51 = vmul.f32 %v582_v50, %v582_v50 }
 0x626   :  { %584 = vadd.xlane.f32.xlu1 %v583_v51 }
 0x699   :  { %v585_v57 = vpop.xlane.xlu1 %584 }
 0x69a   :  { %v586_v58 = vmul.f32 %v585_v57, %v1231_v7 }
 0x69c   :  { %v587_v60 = vadd.f32 1e-05, %v586_v58  ;;  %v714_v58 = vld [vmem:[#allocation10 + $0x220] sm:$0xff] }
 0x69e   :  { %928 = vrsqrt.f32 %v587_v60  ;;  %vm594_vm1 = vweird.f32 %v587_v60 }
 0x6a4   :  { %v929_v2 = vpop.eup %928 }
 0x6a5   :  { %v589_v4 = vmul.f32 %v929_v2, %v587_v60  ;;  %vm595_vm0 = vweird.f32 %v929_v2  ;;  %v713_v60 = vld [vmem:[#allocation10 + $0x218] sm:$0xff] }
 0x6a6   :  { %vm596_vm2 = vmor %vm594_vm1, %vm595_vm0 }
 0x6a7   :  { %v590_v6 = vmul.f32 %v929_v2, %v589_v4 }
 0x6a9   :  { %v591_v9 = vmul.f32 0.5, %v590_v6 }
 0x6ab   :  { %v592_v11 = vsub.f32 1.5, %v591_v9  ;;  %v895_v9 = vld [vmem:[#allocation8 + $0xd] ss:$0 sm:$0xff] }
 0x6ad   :  { %v593_v14 = vmul.f32 %v929_v2, %v592_v11 }
 0x6af   :  { %v597_v16 = vsel %vm596_vm2, %v929_v2, %v593_v14 }
 0x6b0   :  { %v598_v17 = vmul.f32 %v597_v16, %v582_v50  ;;  %v720_v50 = vld [vmem:[#allocation10 + $0x250] sm:$0xff] }
 0x6b1   :  { %733 = vmatpush.msrb.mxu3 %v720_v50 }
 0x6b2   :  { %v600_v19 = vmul.f32 %v891_v15, %v598_v17 }
 0x6b3   :  { %734 = vmatpush.msrb.mxu3 %v719_v52  ;;  %v799_v52 = vld [vmem:[#allocation10 + $0x298] sm:$0xff] }
 0x6b4   :  { %v602_v20 = vadd.f32 %v892_v18, %v600_v19 }
 0x6b5   :  { %735 = vmatpush.msrb.mxu3 %v718_v0 }
 0x6b6   :  { %v865_v21 = vmul.f32 -1.442695, %v602_v20 }
 0x6b7   :  { %736 = vmatpush.msrb.mxu3 %v717_v54  ;;  %v797_v54 = vld [vmem:[#allocation10 + $0x288] sm:$0xff] }
 0x6b8   :  { %930 = vpow2.f32 %v865_v21 }
 0x6b9   :  { %737 = vmatpush.msrb.mxu3 %v716_v55 }
 0x6bb   :  { %738 = vmatpush.msrb.mxu3 %v715_v56  ;;  %v796_v56 = vld [vmem:[#allocation10 + $0x280] sm:$0xff] }
 0x6bd   :  { %739 = vmatpush.msrb.mxu3 %v714_v58  ;;  %v897_v58 = vld [vmem:[#allocation8 + $0xf] ss:$0 sm:$0xff] }
 0x6be   :  { %v931_v22 = vpop.eup %930 }
 0x6bf   :  { %v606_v23 = vadd.f32 1.0, %v931_v22  ;;  %740 = vmatpush.msrb.mxu3 %v713_v60 }
 0x6c1   :  { %932 = vrcp.f32 %v606_v23  ;;  %v618_v26 = vand.u32 2147483648, %v606_v23  ;;  %v616_v29 = vand.u32 2147483647, %v606_v23  ;;  %vm612_vm4 = vweird.f32 %v606_v23  ;;  %741 = vmatpush.msrb.mxu3 %v712_v62 }
 0x6c3   :  { %v619_v31 = vor.u32 1.1754944e-38, %v618_v26  ;;  %vm617_vm6 = vcmp.eq.f32.partialorder %v616_v29, 8.507059e+37  ;;  %742 = vmatpush.msrb.mxu3 %v711_v1  ;;  %v896_v26 = vld [vmem:[#allocation8 + $0xe] ss:$0 sm:$0xff] }
 0x6c5   :  { %743 = vmatpush.msrb.mxu3 %v710_v3 }
 0x6c7   :  { %v933_v13 = vpop.eup %932 }
 0x6c8   :  { %v608_v24 = vmul.f32 %v933_v13, %v606_v23  ;;  %vm613_vm3 = vweird.f32 %v933_v13 }
 0x6c9   :  { %vm614_vm5 = vmor %vm612_vm4, %vm613_vm3 }
 0x6ca   :  { %v609_v25 = vsub.f32 1.0, %v608_v24 }
 0x6cc   :  { %v610_v28 = vmul.f32 %v933_v13, %v609_v25 }
 0x6ce   :  { %v611_v30 = vadd.f32 %v933_v13, %v610_v28 }
 0x6d0   :  { %v615_v32 = vsel %vm614_vm5, %v933_v13, %v611_v30 }
 0x6d1   :  { %v620_v33 = vsel %vm617_vm6, %v619_v31, %v615_v32 }
 0x6d2   :  { %v622_v34 = vmul.f32 %v620_v33, %v602_v20 }
 0x6d4   :  { %658 = vmatmul.f32.vlgmr.msrb.gmra.mxu2 %v622_v34 }
 0x757   :  { %v659_v36 = vpop.f32.mrf.mxu2 }
 0x758   :  { %v660_v37 = vadd.f32 %v893_v35, %v659_v36  ;;  %v811_v35 = vld [vmem:[#allocation10 + $0x2f8] sm:$0xff]  ;;  %v810_v36 = vld [vmem:[#allocation10 + $0x2f0] sm:$0xff] }
 0x759   :  { %814 = vmatpush.msrb.mxu0 %v811_v35 }
 0x75a   :  { %v662_v38 = vadd.f32 %v660_v37, %v1249_v27  ;;  %v809_v37 = vld [vmem:[#allocation10 + $0x2e8] sm:$0xff] }
 0x75b   :  { %815 = vmatpush.msrb.mxu0 %v810_v36 }
 0x75c   :  { %665 = vadd.xlane.f32.xlu2 %v662_v38 }
 0x75d   :  { %816 = vmatpush.msrb.mxu0 %v809_v37 }
 0x7cf   :  { %v666_v39 = vpop.xlane.xlu2 %665 }
 0x7d0   :  { %v667_v40 = vmul.f32 %v666_v39, %v1231_v7  ;;  %v807_v39 = vld [vmem:[#allocation10 + $0x2d8] sm:$0xff] }
 0x7d2   :  { %v668_v41 = vsub.f32 %v662_v38, %v667_v40  ;;  %v808_v38 = vld [vmem:[#allocation10 + $0x2e0] sm:$0xff]  ;;  %v806_v40 = vld [vmem:[#allocation10 + $0x2d0] sm:$0xff] }
 0x7d3   :  { %817 = vmatpush.msrb.mxu0 %v808_v38 }
 0x7d4   :  { %v669_v42 = vmul.f32 %v668_v41, %v668_v41 }
 0x7d5   :  { %818 = vmatpush.msrb.mxu0 %v807_v39 }
 0x7d6   :  { %670 = vadd.xlane.f32.xlu0 %v669_v42  ;;  %v805_v42 = vld [vmem:[#allocation10 + $0x2c8] sm:$0xff] }
 0x7d7   :  { %819 = vmatpush.msrb.mxu0 %v806_v40 }
 0x7d9   :  { %820 = vmatpush.msrb.mxu0 %v805_v42 }
 0x7db   :  { %821 = vmatpush.msrb.mxu0 %v804_v45 }
 0x7dd   :  { %822 = vmatpush.msrb.mxu0 %v803_v46 }
 0x7df   :  { %823 = vmatpush.msrb.mxu0 %v802_v48 }
 0x7e1   :  { %824 = vmatpush.msrb.mxu0 %v801_v49 }
 0x849   :  { %v671_v51 = vpop.xlane.xlu0 %670 }
 0x84a   :  { %v672_v27 = vmul.f32 %v671_v51, %v1231_v7  ;;  %v800_v51 = vld [vmem:[#allocation10 + $0x2a0] sm:$0xff] }
 0x84b   :  { %825 = vmatpush.msrb.mxu0 %v800_v51 }
 0x84c   :  { %v673_v53 = vadd.f32 1e-05, %v672_v27 }
 0x84d   :  { %826 = vmatpush.msrb.mxu0 %v799_v52 }
 0x84e   :  { %934 = vrsqrt.f32 %v673_v53  ;;  %vm680_vm8 = vweird.f32 %v673_v53 }
 0x854   :  { %v935_v57 = vpop.eup %934 }
 0x855   :  { %v675_v59 = vmul.f32 %v935_v57, %v673_v53  ;;  %vm681_vm7 = vweird.f32 %v935_v57 }
 0x856   :  { %vm682_vm9 = vmor %vm680_vm8, %vm681_vm7 }
 0x857   :  { %v676_v61 = vmul.f32 %v935_v57, %v675_v59 }
 0x859   :  { %v677_v63 = vmul.f32 0.5, %v676_v61  ;;  %v898_v61 = vld [vmem:[#allocation8 + $0x10] ss:$0 sm:$0xff] }
 0x85b   :  { %v678_v2 = vsub.f32 1.5, %v677_v63 }
 0x85d   :  { %v679_v4 = vmul.f32 %v935_v57, %v678_v2 }
 0x85f   :  { %v683_v6 = vsel %vm682_vm9, %v935_v57, %v679_v4 }
 0x860   :  { %v684_v8 = vmul.f32 %v683_v6, %v668_v41 }
 0x862   :  { %v686_v10 = vmul.f32 %v894_v5, %v684_v8 }
 0x864   :  { %v688_v11 = vadd.f32 %v895_v9, %v686_v10 }
 0x866   :  { %v866_v12 = vmul.f32 -1.442695, %v688_v11 }
 0x868   :  { %936 = vpow2.f32 %v866_v12 }
 0x86e   :  { %v937_v14 = vpop.eup %936 }
 0x86f   :  { %v692_v15 = vadd.f32 1.0, %v937_v14 }
 0x871   :  { %938 = vrcp.f32 %v692_v15  ;;  %v704_v19 = vand.u32 2147483648, %v692_v15  ;;  %v702_v21 = vand.u32 2147483647, %v692_v15  ;;  %vm698_vm11 = vweird.f32 %v692_v15 }
 0x873   :  { %v705_v23 = vor.u32 1.1754944e-38, %v704_v19  ;;  %vm703_vm13 = vcmp.eq.f32.partialorder %v702_v21, 8.507059e+37 }
 0x877   :  { %v939_v16 = vpop.eup %938 }
 0x878   :  { %v694_v17 = vmul.f32 %v939_v16, %v692_v15  ;;  %vm699_vm10 = vweird.f32 %v939_v16 }
 0x879   :  { %vm700_vm12 = vmor %vm698_vm11, %vm699_vm10 }
 0x87a   :  { %v695_v18 = vsub.f32 1.0, %v694_v17  ;;  %v899_v17 = vld [vmem:[#allocation8 + $0x11] ss:$0 sm:$0xff] }
 0x87c   :  { %v696_v20 = vmul.f32 %v939_v16, %v695_v18 }
 0x87e   :  { %v697_v22 = vadd.f32 %v939_v16, %v696_v20 }
 0x880   :  { %v701_v13 = vsel %vm700_vm12, %v939_v16, %v697_v22 }
 0x881   :  { %v706_v24 = vsel %vm703_vm13, %v705_v23, %v701_v13 }
 0x882   :  { %v708_v25 = vmul.f32 %v706_v24, %v688_v11 }
 0x884   :  { %744 = vmatmul.f32.vlgmr.msrb.gmra.mxu3 %v708_v25 }
 0x907   :  { %v745_v28 = vpop.f32.mrf.mxu3 }
 0x908   :  { %v746_v29 = vadd.f32 %v896_v26, %v745_v28 }
 0x90a   :  { %v748_v30 = vadd.f32 %v746_v29, %v1256_v43 }
 0x90c   :  { %751 = vadd.xlane.f32.xlu1 %v748_v30 }
 0x97f   :  { %v752_v31 = vpop.xlane.xlu1 %751 }
 0x980   :  { %v753_v32 = vmul.f32 %v752_v31, %v1231_v7 }
 0x982   :  { %v754_v33 = vsub.f32 %v748_v30, %v753_v32 }
 0x984   :  { %v755_v34 = vmul.f32 %v754_v33, %v754_v33 }
 0x986   :  { %756 = vadd.xlane.f32.xlu2 %v755_v34 }
 0x9f9   :  { %v757_v41 = vpop.xlane.xlu2 %756 }
 0x9fa   :  { %v758_v43 = vmul.f32 %v757_v41, %v1231_v7  ;;  %v798_v7 = vld [vmem:[#allocation10 + $0x290] sm:$0xff] }
 0x9fb   :  { %827 = vmatpush.msrb.mxu0 %v798_v7 }
 0x9fc   :  { %v759_v44 = vadd.f32 1e-05, %v758_v43 }
 0x9fd   :  { %828 = vmatpush.msrb.mxu0 %v797_v54 }
 0x9fe   :  { %940 = vrsqrt.f32 %v759_v44  ;;  %vm766_vm15 = vweird.f32 %v759_v44 }
 0x9ff   :  { %829 = vmatpush.msrb.mxu0 %v796_v56 }
 0xa04   :  { %v941_v50 = vpop.eup %940 }
 0xa05   :  { %v761_v27 = vmul.f32 %v941_v50, %v759_v44  ;;  %vm767_vm14 = vweird.f32 %v941_v50 }
 0xa06   :  { %vm768_vm0 = vmor %vm766_vm15, %vm767_vm14 }
 0xa07   :  { %v762_v53 = vmul.f32 %v941_v50, %v761_v27 }
 0xa09   :  { %v763_v0 = vmul.f32 0.5, %v762_v53 }
 0xa0b   :  { %v764_v55 = vsub.f32 1.5, %v763_v0 }
 0xa0d   :  { %v765_v57 = vmul.f32 %v941_v50, %v764_v55 }
 0xa0f   :  { %v769_v59 = vsel %vm768_vm0, %v941_v50, %v765_v57 }
 0xa10   :  { %v770_v60 = vmul.f32 %v769_v59, %v754_v33 }
 0xa12   :  { %v772_v62 = vmul.f32 %v897_v58, %v770_v60 }
 0xa14   :  { %v774_v63 = vadd.f32 %v898_v61, %v772_v62 }
 0xa16   :  { %v867_v1 = vmul.f32 -1.442695, %v774_v63 }
 0xa18   :  { %942 = vpow2.f32 %v867_v1 }
 0xa1e   :  { %v943_v2 = vpop.eup %942 }
 0xa1f   :  { %v778_v3 = vadd.f32 1.0, %v943_v2 }
 0xa21   :  { %944 = vrcp.f32 %v778_v3  ;;  %v790_v8 = vand.u32 2147483648, %v778_v3  ;;  %v788_v10 = vand.u32 2147483647, %v778_v3  ;;  %vm784_vm2 = vweird.f32 %v778_v3 }
 0xa23   :  { %v791_v12 = vor.u32 1.1754944e-38, %v790_v8  ;;  %vm789_vm4 = vcmp.eq.f32.partialorder %v788_v10, 8.507059e+37 }
 0xa27   :  { %v945_v4 = vpop.eup %944 }
 0xa28   :  { %v780_v5 = vmul.f32 %v945_v4, %v778_v3  ;;  %vm785_vm1 = vweird.f32 %v945_v4 }
 0xa29   :  { %vm786_vm3 = vmor %vm784_vm2, %vm785_vm1 }
 0xa2a   :  { %v781_v6 = vsub.f32 1.0, %v780_v5 }
 0xa2c   :  { %v782_v9 = vmul.f32 %v945_v4, %v781_v6 }
 0xa2e   :  { %v783_v11 = vadd.f32 %v945_v4, %v782_v9 }
 0xa30   :  { %v787_v14 = vsel %vm786_vm3, %v945_v4, %v783_v11 }
 0xa31   :  { %v792_v15 = vsel %vm789_vm4, %v791_v12, %v787_v14 }
 0xa32   :  { %v794_v16 = vmul.f32 %v792_v15, %v774_v63 }
 0xa34   :  { %830 = vmatmul.f32.vlgmr.msrb.gmra.mxu0 %v794_v16 }
 0xab1   :  { %v831_v18 = vpop.f32.mrf.mxu0 }
 0xab2   :  { %v832_v19 = vadd.f32 %v899_v17, %v831_v18 }
 0xab4   :  { %v834_v20 = vadd.f32 %v832_v19, %v1258_v47 }
 0xab6   :  { %835 = vst [vmem:[#allocation14] sm:$0xff] %v834_v20 }
 0xab7   :  { %846 = dma.vmem_to_hbm [thread:$0]  %s842_s6, 128, %s844_s13, [#allocation4]  }
 0xab8   :  { %1146 = dma.done.wait [#allocation4], 128  }
 0xab9   :  { %1147 = vsyncadd [#allocation4], 4294967168 }
 0xaba   :  { %851 = vsyncpa [#allocation3], 1 }
 0xabb   :  { %852 = vsyncpa [#allocation6], 1 }
 0xabc   :  { %853 = vsyncpa [#allocation9], 1 }
 0xabd   :  { %854 = vsyncpa [#allocation12], 1 }
 0xabe   :  { %855 = vsyncpa [#allocation4], 1 }

</bundles_post_ra>
